<compile_context>
chip_gen: v7x
topology: tpu7x:2x2x1
jax: 0.10.0
libtpu: 0.0.40
codegen_flags: <defaults>
</compile_context>

<pallas_src>
import jax
import jax.numpy as jnp
from jax import lax
from jax.experimental import pallas as pl
from jax.experimental.pallas import tpu as pltpu

NEG_SLOPE = 0.01  # PyTorch F.leaky_relu default


def _round_up(x, m):
    return ((x + m - 1) // m) * m


def _pick_tm(m):
    """Row-tile size: multiple of 16 (bf16 sublane packing), capped for VMEM."""
    if m >= 1024:
        return 512
    if m > 256:
        return 256
    return _round_up(max(m, 16), 16)


_COMPILER_PARAMS = pltpu.CompilerParams(
    dimension_semantics=("parallel",),
    vmem_limit_bytes=32 * 1024 * 1024,
)


# --------------------------------------------------------------------------
# Fused conv(5x5) + bias + LeakyReLU + MaxPool2d(2) block
# --------------------------------------------------------------------------
def _conv_pool_kernel(p0_ref, p1_ref, p2_ref, p3_ref, w_ref, b_ref, o_ref):
    """p*_ref: (TM, K) bf16 im2col rows for the four 2x2 pool offsets.
    w_ref: (K, Cout) bf16.  b_ref: (1, Cout) f32.  o_ref: (TM, Cout) bf16."""
    w = w_ref[...]
    a0 = jnp.dot(p0_ref[...], w, preferred_element_type=jnp.float32)
    a1 = jnp.dot(p1_ref[...], w, preferred_element_type=jnp.float32)
    a2 = jnp.dot(p2_ref[...], w, preferred_element_type=jnp.float32)
    a3 = jnp.dot(p3_ref[...], w, preferred_element_type=jnp.float32)
    pooled = jnp.maximum(jnp.maximum(a0, a1), jnp.maximum(a2, a3))  # 2x2 max-pool
    z = pooled + b_ref[...]
    o_ref[...] = jnp.maximum(z, NEG_SLOPE * z).astype(o_ref.dtype)  # LeakyReLU


def conv_pool_block(x_nhwc, w_hwio, bias, padding):
    """conv5x5(padding) -> LeakyReLU -> MaxPool2d(2); NHWC in, NHWC bf16 out."""
    n, h, w, cin = x_nhwc.shape
    kh, kw, _, cout = w_hwio.shape
    xp = jnp.pad(x_nhwc.astype(jnp.bfloat16),
                 ((0, 0), (padding, padding), (padding, padding), (0, 0)))
    hc = h + 2 * padding - kh + 1          # conv output spatial extent
    wc = w + 2 * padding - kw + 1
    hout, wout = hc // 2, wc // 2          # after 2x2 max-pool
    k = kh * kw * cin
    m = n * hout * wout

    tm = _pick_tm(m)
    m_pad = _round_up(m, tm)

    def make_slab(a, b):
        """im2col slab for pool offset (a, b); K ordered (ky, kx, cin)."""
        cols = []
        for dy in range(kh):
            for dx in range(kw):
                cols.append(xp[:, a + dy: a + dy + 2 * hout: 2,
                                  b + dx: b + dx + 2 * wout: 2, :])
        slab = jnp.stack(cols, axis=3).reshape(m, k)   # (M, K)
        if m_pad != m:
            slab = jnp.pad(slab, ((0, m_pad - m), (0, 0)))
        return slab

    slabs = [make_slab(a, b) for a in (0, 1) for b in (0, 1)]

    w2d = w_hwio.reshape(k, cout).astype(jnp.bfloat16)
    b2d = bias.reshape(1, cout).astype(jnp.float32)

    row_spec = pl.BlockSpec((tm, k), lambda i: (i, 0))
    out = pl.pallas_call(
        _conv_pool_kernel,
        grid=(m_pad // tm,),
        in_specs=[row_spec, row_spec, row_spec, row_spec,
                  pl.BlockSpec((k, cout), lambda i: (0, 0)),
                  pl.BlockSpec((1, cout), lambda i: (0, 0))],
        out_specs=pl.BlockSpec((tm, cout), lambda i: (i, 0)),
        out_shape=jax.ShapeDtypeStruct((m_pad, cout), jnp.bfloat16),
        compiler_params=_COMPILER_PARAMS,
    )(*slabs, w2d, b2d)
    return out[:m].reshape(n, hout, wout, cout)


# --------------------------------------------------------------------------
# Fused FC head: fc1 + LeakyReLU + cls + reshape + L2-normalize
# --------------------------------------------------------------------------
def _fc_head_kernel(x_ref, w1_ref, b1_ref, wc_ref, bc_ref, wr_ref, br_ref,
                    y_ref, f_ref):
    h = jnp.dot(x_ref[...], w1_ref[...], preferred_element_type=jnp.float32)
    h = h + b1_ref[...]
    h = jnp.maximum(h, NEG_SLOPE * h)                              # LeakyReLU
    hb = h.astype(jnp.bfloat16)
    y_ref[...] = (jnp.dot(hb, wc_ref[...], preferred_element_type=jnp.float32)
                  + bc_ref[...])                                   # padded logits
    f = (jnp.dot(hb, wr_ref[...], preferred_element_type=jnp.float32)
         + br_ref[...])                                            # reshape proj
    ssq = jnp.sum(f * f, axis=-1, keepdims=True)
    f_ref[...] = f * lax.rsqrt(jnp.maximum(ssq, 1e-24))            # F.normalize


def fc_head(feats, w1, b1, wc, bc, wr, br):
    n, kin = feats.shape
    d_hid = w1.shape[1]
    n_cls = wc.shape[1]
    d_feat = wr.shape[1]
    n_cls_pad = _round_up(n_cls, 128)      # lane-dense logits output

    tn = _pick_tm(n)
    n_pad = _round_up(n, tn)
    x = feats.astype(jnp.bfloat16)
    if n_pad != n:
        x = jnp.pad(x, ((0, n_pad - n), (0, 0)))

    wc_p = jnp.pad(wc, ((0, 0), (0, n_cls_pad - n_cls))).astype(jnp.bfloat16)
    bc_p = jnp.pad(bc, (0, n_cls_pad - n_cls)).reshape(1, -1).astype(jnp.float32)

    y, f = pl.pallas_call(
        _fc_head_kernel,
        grid=(n_pad // tn,),
        in_specs=[
            pl.BlockSpec((tn, kin), lambda i: (i, 0)),
            pl.BlockSpec((kin, d_hid), lambda i: (0, 0)),
            pl.BlockSpec((1, d_hid), lambda i: (0, 0)),
            pl.BlockSpec((d_hid, n_cls_pad), lambda i: (0, 0)),
            pl.BlockSpec((1, n_cls_pad), lambda i: (0, 0)),
            pl.BlockSpec((d_hid, d_feat), lambda i: (0, 0)),
            pl.BlockSpec((1, d_feat), lambda i: (0, 0)),
        ],
        out_specs=[
            pl.BlockSpec((tn, n_cls_pad), lambda i: (i, 0)),
            pl.BlockSpec((tn, d_feat), lambda i: (i, 0)),
        ],
        out_shape=(
            jax.ShapeDtypeStruct((n_pad, n_cls_pad), jnp.float32),
            jax.ShapeDtypeStruct((n_pad, d_feat), jnp.float32),
        ),
        compiler_params=_COMPILER_PARAMS,
    )(x,
      w1.astype(jnp.bfloat16), b1.reshape(1, -1).astype(jnp.float32),
      wc_p, bc_p,
      wr.astype(jnp.bfloat16), br.reshape(1, -1).astype(jnp.float32))
    return f[:n], y[:n, :n_cls]


# --------------------------------------------------------------------------
# Full forward (matches CNN_FMNIST.forward: returns (f_normalized, logits))
# --------------------------------------------------------------------------
def cnn_fmnist_forward(x_nchw, params):
    h = jnp.transpose(x_nchw, (0, 2, 3, 1)).astype(jnp.float32)  # NCHW -> NHWC
    h = conv_pool_block(h, params["conv1_w"], params["conv1_b"], padding=0)
    h = conv_pool_block(h, params["conv2_w"], params["conv2_b"], padding=1)
    n, hh, ww, cc = h.shape
    # PyTorch flattens activations in (C, H, W) order; instead of relayouting
    # the (batch-sized) activation we permute the tiny fc1 weight rows once so
    # it consumes the NHWC-flattened features directly.
    feats = h.reshape(n, hh * ww * cc)                           # (N, 800) bf16
    w1 = (params["fc1_w"].reshape(cc, hh, ww, -1)
          .transpose(1, 2, 0, 3).reshape(hh * ww * cc, -1))
    f, y = fc_head(feats, w1, params["fc1_b"],
                   params["cls_w"], params["cls_b"],
                   params["reshape_w"], params["reshape_b"])
    return f, y


# --------------------------------------------------------------------------
# Parameters (conv weights stored HWIO; linear weights stored (in, out))
# --------------------------------------------------------------------------
def init_params(key):
    keys = jax.random.split(key, 10)

    def u(k, shape, fan_in):
        bound = float(1.0 / (fan_in ** 0.5))
        return jax.random.uniform(k, shape, jnp.float32, -bound, bound)

    return {
        "conv1_w": u(keys[0], (5, 5, 1, 16), 25),
        "conv1_b": u(keys[1], (16,), 25),
        "conv2_w": u(keys[2], (5, 5, 16, 32), 400),
        "conv2_b": u(keys[3], (32,), 400),
        "fc1_w": u(keys[4], (800, 128), 800),
        "fc1_b": u(keys[5], (128,), 800),
        "cls_w": u(keys[6], (128, 10), 128),
        "cls_b": u(keys[7], (10,), 128),
        "reshape_w": u(keys[8], (128, 128), 128),
        "reshape_b": u(keys[9], (128,), 128),
    }


def reference_forward(x_nchw, params):
    """Pure-JAX f32 reference (XLA conv / reduce_window) for correctness."""
    def leaky(v):
        return jnp.where(v > 0, v, NEG_SLOPE * v)

    def block(h, w, b, pad):
        h = lax.conv_general_dilated(h, w, (1, 1), ((pad, pad), (pad, pad)),
                                     dimension_numbers=("NHWC", "HWIO", "NHWC"))
        h = leaky(h + b)
        return lax.reduce_window(h, -jnp.inf, lax.max,
                                 (1, 2, 2, 1), (1, 2, 2, 1), "VALID")

    h = jnp.transpose(x_nchw, (0, 2, 3, 1)).astype(jnp.float32)
    h = block(h, params["conv1_w"], params["conv1_b"], 0)
    h = block(h, params["conv2_w"], params["conv2_b"], 1)
    n = h.shape[0]
    feats = jnp.transpose(h, (0, 3, 1, 2)).reshape(n, -1)        # (C,H,W) flatten
    hfc = leaky(feats @ params["fc1_w"] + params["fc1_b"])
    y = hfc @ params["cls_w"] + params["cls_b"]
    fr = hfc @ params["reshape_w"] + params["reshape_b"]
    norm = jnp.sqrt(jnp.sum(fr * fr, axis=-1, keepdims=True))
    f = fr / jnp.maximum(norm, 1e-12)
    return f, y


if __name__ == "__main__":
    key = jax.random.PRNGKey(0)
    pkey, xkey = jax.random.split(key)
    params = init_params(pkey)
    # FMNIST-shaped input (the fc1 layer requires 1x28x28 input), batch=2.
    x = jax.random.normal(xkey, (2, 1, 28, 28), jnp.float32)

    f, y = jax.jit(cnn_fmnist_forward)(x, params)
    jax.block_until_ready((f, y))

    assert f.shape == (2, 128), f.shape
    assert y.shape == (2, 10), y.shape

    rf, ry = reference_forward(x, params)
    assert jnp.allclose(y, ry, rtol=2e-2, atol=2e-2), "logits mismatch"
    assert jnp.allclose(f, rf, rtol=2e-2, atol=2e-2), "normalized feature mismatch"
    assert jnp.allclose(jnp.linalg.norm(f, axis=-1), 1.0, atol=1e-3), "norm != 1"

    print("KERNEL_OK")
</pallas_src>

<mosaic_0001>
module attributes {stable_mosaic.version = 11 : i64} {
  func.func @_conv_pool_kernel(%arg0: i32, %arg1: memref<256x25xbf16, #tpu.memory_space<vmem>>, %arg2: memref<256x25xbf16, #tpu.memory_space<vmem>>, %arg3: memref<256x25xbf16, #tpu.memory_space<vmem>>, %arg4: memref<256x25xbf16, #tpu.memory_space<vmem>>, %arg5: memref<25x16xbf16, #tpu.memory_space<vmem>>, %arg6: memref<1x16xf32, #tpu.memory_space<vmem>>, %arg7: memref<256x16xbf16, #tpu.memory_space<vmem>>) attributes {dimension_semantics = [#tpu.dimension_semantics<parallel>], iteration_bounds = array<i64: 2>, scalar_prefetch = 0 : i64, scratch_operands = 0 : i64, tpu.core_type = #tpu.core_type<tc>, window_params = [{transform_indices = @transform_0, window_bounds = array<i64: 256, 25>}, {transform_indices = @transform_1, window_bounds = array<i64: 256, 25>}, {transform_indices = @transform_2, window_bounds = array<i64: 256, 25>}, {transform_indices = @transform_3, window_bounds = array<i64: 256, 25>}, {pipeline_mode = #tpu.pipeline_mode<synchronous>, transform_indices = @transform_4, window_bounds = array<i64: 25, 16>}, {pipeline_mode = #tpu.pipeline_mode<synchronous>, transform_indices = @transform_5, window_bounds = array<i64: 1, 16>}, {transform_indices = @transform_6, window_bounds = array<i64: 256, 16>}]} {
    %c0 = arith.constant 0 : index
    %c0_0 = arith.constant 0 : index
    %0 = vector.load %arg5[%c0, %c0_0] : memref<25x16xbf16, #tpu.memory_space<vmem>>, vector<25x16xbf16>
    %c0_1 = arith.constant 0 : index
    %c0_2 = arith.constant 0 : index
    %1 = vector.load %arg1[%c0_1, %c0_2] : memref<256x25xbf16, #tpu.memory_space<vmem>>, vector<256x25xbf16>
    %cst = arith.constant dense<0.000000e+00> : vector<256x16xf32>
    %2 = tpu.matmul %1, %0, %cst {dimension_numbers = #tpu.dot_dimension_numbers<[1], [0], [0], [1], [0, 0, 1, 1], [], []>} : vector<256x25xbf16>, vector<25x16xbf16>, vector<256x16xf32> -> vector<256x16xf32>
    %c0_3 = arith.constant 0 : index
    %c0_4 = arith.constant 0 : index
    %3 = vector.load %arg2[%c0_3, %c0_4] : memref<256x25xbf16, #tpu.memory_space<vmem>>, vector<256x25xbf16>
    %cst_5 = arith.constant dense<0.000000e+00> : vector<256x16xf32>
    %4 = tpu.matmul %3, %0, %cst_5 {dimension_numbers = #tpu.dot_dimension_numbers<[1], [0], [0], [1], [0, 0, 1, 1], [], []>} : vector<256x25xbf16>, vector<25x16xbf16>, vector<256x16xf32> -> vector<256x16xf32>
    %c0_6 = arith.constant 0 : index
    %c0_7 = arith.constant 0 : index
    %5 = vector.load %arg3[%c0_6, %c0_7] : memref<256x25xbf16, #tpu.memory_space<vmem>>, vector<256x25xbf16>
    %cst_8 = arith.constant dense<0.000000e+00> : vector<256x16xf32>
    %6 = tpu.matmul %5, %0, %cst_8 {dimension_numbers = #tpu.dot_dimension_numbers<[1], [0], [0], [1], [0, 0, 1, 1], [], []>} : vector<256x25xbf16>, vector<25x16xbf16>, vector<256x16xf32> -> vector<256x16xf32>
    %c0_9 = arith.constant 0 : index
    %c0_10 = arith.constant 0 : index
    %7 = vector.load %arg4[%c0_9, %c0_10] : memref<256x25xbf16, #tpu.memory_space<vmem>>, vector<256x25xbf16>
    %cst_11 = arith.constant dense<0.000000e+00> : vector<256x16xf32>
    %8 = tpu.matmul %7, %0, %cst_11 {dimension_numbers = #tpu.dot_dimension_numbers<[1], [0], [0], [1], [0, 0, 1, 1], [], []>} : vector<256x25xbf16>, vector<25x16xbf16>, vector<256x16xf32> -> vector<256x16xf32>
    %9 = arith.maximumf %2, %4 : vector<256x16xf32>
    %10 = arith.maximumf %6, %8 : vector<256x16xf32>
    %11 = arith.maximumf %9, %10 : vector<256x16xf32>
    %c0_12 = arith.constant 0 : index
    %c0_13 = arith.constant 0 : index
    %12 = vector.load %arg6[%c0_12, %c0_13] : memref<1x16xf32, #tpu.memory_space<vmem>>, vector<1x16xf32>
    %13 = vector.broadcast %12 : vector<1x16xf32> to vector<256x16xf32>
    %14 = arith.addf %11, %13 : vector<256x16xf32>
    %cst_14 = arith.constant 0.00999999977 : f32
    %15 = vector.broadcast %cst_14 : f32 to vector<256x16xf32>
    %16 = arith.mulf %15, %14 : vector<256x16xf32>
    %17 = arith.maximumf %14, %16 : vector<256x16xf32>
    %18 = arith.truncf %17 : vector<256x16xf32> to vector<256x16xbf16>
    %c0_15 = arith.constant 0 : index
    %c0_16 = arith.constant 0 : index
    %19 = vector.load %arg7[%c0_15, %c0_16] : memref<256x16xbf16, #tpu.memory_space<vmem>>, vector<256x16xbf16>
    tpu.vector_store %arg7[%c0_15, %c0_16], %18 {strides = array<i32>} : memref<256x16xbf16, #tpu.memory_space<vmem>>, vector<256x16xbf16>,
    return
  }
  func.func @transform_0(%arg0: i32) -> (i32, i32) {
    %c0_i32 = arith.constant 0 : i32
    %c0_i32_0 = arith.constant 0 : i32
    return %arg0, %c0_i32 : i32, i32
  }
  func.func @transform_1(%arg0: i32) -> (i32, i32) {
    %c0_i32 = arith.constant 0 : i32
    %c0_i32_0 = arith.constant 0 : i32
    return %arg0, %c0_i32 : i32, i32
  }
  func.func @transform_2(%arg0: i32) -> (i32, i32) {
    %c0_i32 = arith.constant 0 : i32
    %c0_i32_0 = arith.constant 0 : i32
    return %arg0, %c0_i32 : i32, i32
  }
  func.func @transform_3(%arg0: i32) -> (i32, i32) {
    %c0_i32 = arith.constant 0 : i32
    %c0_i32_0 = arith.constant 0 : i32
    return %arg0, %c0_i32 : i32, i32
  }
  func.func @transform_4(%arg0: i32) -> (i32, i32) {
    %c0_i32 = arith.constant 0 : i32
    %c0_i32_0 = arith.constant 0 : i32
    %c0_i32_1 = arith.constant 0 : i32
    return %c0_i32, %c0_i32_0 : i32, i32
  }
  func.func @transform_5(%arg0: i32) -> (i32, i32) {
    %c0_i32 = arith.constant 0 : i32
    %c0_i32_0 = arith.constant 0 : i32
    %c0_i32_1 = arith.constant 0 : i32
    return %c0_i32, %c0_i32_0 : i32, i32
  }
  func.func @transform_6(%arg0: i32) -> (i32, i32) {
    %c0_i32 = arith.constant 0 : i32
    %c0_i32_0 = arith.constant 0 : i32
    return %arg0, %c0_i32 : i32, i32
  }
}

module attributes {stable_mosaic.version = 11 : i64} {
  func.func @_conv_pool_kernel(%arg0: i32, %arg1: memref<64x400xbf16, #tpu.memory_space<vmem>>, %arg2: memref<64x400xbf16, #tpu.memory_space<vmem>>, %arg3: memref<64x400xbf16, #tpu.memory_space<vmem>>, %arg4: memref<64x400xbf16, #tpu.memory_space<vmem>>, %arg5: memref<400x32xbf16, #tpu.memory_space<vmem>>, %arg6: memref<1x32xf32, #tpu.memory_space<vmem>>, %arg7: memref<64x32xbf16, #tpu.memory_space<vmem>>) attributes {dimension_semantics = [#tpu.dimension_semantics<parallel>], iteration_bounds = array<i64: 1>, scalar_prefetch = 0 : i64, scratch_operands = 0 : i64, tpu.core_type = #tpu.core_type<tc>, window_params = [{transform_indices = @transform_0, window_bounds = array<i64: 64, 400>}, {transform_indices = @transform_1, window_bounds = array<i64: 64, 400>}, {transform_indices = @transform_2, window_bounds = array<i64: 64, 400>}, {transform_indices = @transform_3, window_bounds = array<i64: 64, 400>}, {pipeline_mode = #tpu.pipeline_mode<synchronous>, transform_indices = @transform_4, window_bounds = array<i64: 400, 32>}, {pipeline_mode = #tpu.pipeline_mode<synchronous>, transform_indices = @transform_5, window_bounds = array<i64: 1, 32>}, {transform_indices = @transform_6, window_bounds = array<i64: 64, 32>}]} {
    %c0 = arith.constant 0 : index
    %c0_0 = arith.constant 0 : index
    %0 = vector.load %arg5[%c0, %c0_0] : memref<400x32xbf16, #tpu.memory_space<vmem>>, vector<400x32xbf16>
    %c0_1 = arith.constant 0 : index
    %c0_2 = arith.constant 0 : index
    %1 = vector.load %arg1[%c0_1, %c0_2] : memref<64x400xbf16, #tpu.memory_space<vmem>>, vector<64x400xbf16>
    %cst = arith.constant dense<0.000000e+00> : vector<64x32xf32>
    %2 = tpu.matmul %1, %0, %cst {dimension_numbers = #tpu.dot_dimension_numbers<[1], [0], [0], [1], [0, 0, 1, 1], [], []>} : vector<64x400xbf16>, vector<400x32xbf16>, vector<64x32xf32> -> vector<64x32xf32>
    %c0_3 = arith.constant 0 : index
    %c0_4 = arith.constant 0 : index
    %3 = vector.load %arg2[%c0_3, %c0_4] : memref<64x400xbf16, #tpu.memory_space<vmem>>, vector<64x400xbf16>
    %cst_5 = arith.constant dense<0.000000e+00> : vector<64x32xf32>
    %4 = tpu.matmul %3, %0, %cst_5 {dimension_numbers = #tpu.dot_dimension_numbers<[1], [0], [0], [1], [0, 0, 1, 1], [], []>} : vector<64x400xbf16>, vector<400x32xbf16>, vector<64x32xf32> -> vector<64x32xf32>
    %c0_6 = arith.constant 0 : index
    %c0_7 = arith.constant 0 : index
    %5 = vector.load %arg3[%c0_6, %c0_7] : memref<64x400xbf16, #tpu.memory_space<vmem>>, vector<64x400xbf16>
    %cst_8 = arith.constant dense<0.000000e+00> : vector<64x32xf32>
    %6 = tpu.matmul %5, %0, %cst_8 {dimension_numbers = #tpu.dot_dimension_numbers<[1], [0], [0], [1], [0, 0, 1, 1], [], []>} : vector<64x400xbf16>, vector<400x32xbf16>, vector<64x32xf32> -> vector<64x32xf32>
    %c0_9 = arith.constant 0 : index
    %c0_10 = arith.constant 0 : index
    %7 = vector.load %arg4[%c0_9, %c0_10] : memref<64x400xbf16, #tpu.memory_space<vmem>>, vector<64x400xbf16>
    %cst_11 = arith.constant dense<0.000000e+00> : vector<64x32xf32>
    %8 = tpu.matmul %7, %0, %cst_11 {dimension_numbers = #tpu.dot_dimension_numbers<[1], [0], [0], [1], [0, 0, 1, 1], [], []>} : vector<64x400xbf16>, vector<400x32xbf16>, vector<64x32xf32> -> vector<64x32xf32>
    %9 = arith.maximumf %2, %4 : vector<64x32xf32>
    %10 = arith.maximumf %6, %8 : vector<64x32xf32>
    %11 = arith.maximumf %9, %10 : vector<64x32xf32>
    %c0_12 = arith.constant 0 : index
    %c0_13 = arith.constant 0 : index
    %12 = vector.load %arg6[%c0_12, %c0_13] : memref<1x32xf32, #tpu.memory_space<vmem>>, vector<1x32xf32>
    %13 = vector.broadcast %12 : vector<1x32xf32> to vector<64x32xf32>
    %14 = arith.addf %11, %13 : vector<64x32xf32>
    %cst_14 = arith.constant 0.00999999977 : f32
    %15 = vector.broadcast %cst_14 : f32 to vector<64x32xf32>
    %16 = arith.mulf %15, %14 : vector<64x32xf32>
    %17 = arith.maximumf %14, %16 : vector<64x32xf32>
    %18 = arith.truncf %17 : vector<64x32xf32> to vector<64x32xbf16>
    %c0_15 = arith.constant 0 : index
    %c0_16 = arith.constant 0 : index
    %19 = vector.load %arg7[%c0_15, %c0_16] : memref<64x32xbf16, #tpu.memory_space<vmem>>, vector<64x32xbf16>
    tpu.vector_store %arg7[%c0_15, %c0_16], %18 {strides = array<i32>} : memref<64x32xbf16, #tpu.memory_space<vmem>>, vector<64x32xbf16>,
    return
  }
  func.func @transform_0(%arg0: i32) -> (i32, i32) {
    %c0_i32 = arith.constant 0 : i32
    %c0_i32_0 = arith.constant 0 : i32
    return %arg0, %c0_i32 : i32, i32
  }
  func.func @transform_1(%arg0: i32) -> (i32, i32) {
    %c0_i32 = arith.constant 0 : i32
    %c0_i32_0 = arith.constant 0 : i32
    return %arg0, %c0_i32 : i32, i32
  }
  func.func @transform_2(%arg0: i32) -> (i32, i32) {
    %c0_i32 = arith.constant 0 : i32
    %c0_i32_0 = arith.constant 0 : i32
    return %arg0, %c0_i32 : i32, i32
  }
  func.func @transform_3(%arg0: i32) -> (i32, i32) {
    %c0_i32 = arith.constant 0 : i32
    %c0_i32_0 = arith.constant 0 : i32
    return %arg0, %c0_i32 : i32, i32
  }
  func.func @transform_4(%arg0: i32) -> (i32, i32) {
    %c0_i32 = arith.constant 0 : i32
    %c0_i32_0 = arith.constant 0 : i32
    %c0_i32_1 = arith.constant 0 : i32
    return %c0_i32, %c0_i32_0 : i32, i32
  }
  func.func @transform_5(%arg0: i32) -> (i32, i32) {
    %c0_i32 = arith.constant 0 : i32
    %c0_i32_0 = arith.constant 0 : i32
    %c0_i32_1 = arith.constant 0 : i32
    return %c0_i32, %c0_i32_0 : i32, i32
  }
  func.func @transform_6(%arg0: i32) -> (i32, i32) {
    %c0_i32 = arith.constant 0 : i32
    %c0_i32_0 = arith.constant 0 : i32
    return %arg0, %c0_i32 : i32, i32
  }
}

module attributes {stable_mosaic.version = 11 : i64} {
  func.func @_fc_head_kernel(%arg0: i32, %arg1: memref<16x800xbf16, #tpu.memory_space<vmem>>, %arg2: memref<800x128xbf16, #tpu.memory_space<vmem>>, %arg3: memref<1x128xf32, #tpu.memory_space<vmem>>, %arg4: memref<128x128xbf16, #tpu.memory_space<vmem>>, %arg5: memref<1x128xf32, #tpu.memory_space<vmem>>, %arg6: memref<128x128xbf16, #tpu.memory_space<vmem>>, %arg7: memref<1x128xf32, #tpu.memory_space<vmem>>, %arg8: memref<16x128xf32, #tpu.memory_space<vmem>>, %arg9: memref<16x128xf32, #tpu.memory_space<vmem>>) attributes {dimension_semantics = [#tpu.dimension_semantics<parallel>], iteration_bounds = array<i64: 1>, scalar_prefetch = 0 : i64, scratch_operands = 0 : i64, tpu.core_type = #tpu.core_type<tc>, window_params = [{transform_indices = @transform_0, window_bounds = array<i64: 16, 800>}, {pipeline_mode = #tpu.pipeline_mode<synchronous>, transform_indices = @transform_1, window_bounds = array<i64: 800, 128>}, {pipeline_mode = #tpu.pipeline_mode<synchronous>, transform_indices = @transform_2, window_bounds = array<i64: 1, 128>}, {pipeline_mode = #tpu.pipeline_mode<synchronous>, transform_indices = @transform_3, window_bounds = array<i64: 128, 128>}, {pipeline_mode = #tpu.pipeline_mode<synchronous>, transform_indices = @transform_4, window_bounds = array<i64: 1, 128>}, {pipeline_mode = #tpu.pipeline_mode<synchronous>, transform_indices = @transform_5, window_bounds = array<i64: 128, 128>}, {pipeline_mode = #tpu.pipeline_mode<synchronous>, transform_indices = @transform_6, window_bounds = array<i64: 1, 128>}, {transform_indices = @transform_7, window_bounds = array<i64: 16, 128>}, {transform_indices = @transform_8, window_bounds = array<i64: 16, 128>}]} {
    %c0 = arith.constant 0 : index
    %c0_0 = arith.constant 0 : index
    %0 = vector.load %arg1[%c0, %c0_0] : memref<16x800xbf16, #tpu.memory_space<vmem>>, vector<16x800xbf16>
    %c0_1 = arith.constant 0 : index
    %c0_2 = arith.constant 0 : index
    %1 = vector.load %arg2[%c0_1, %c0_2] : memref<800x128xbf16, #tpu.memory_space<vmem>>, vector<800x128xbf16>
    %cst = arith.constant dense<0.000000e+00> : vector<16x128xf32>
    %2 = tpu.matmul %0, %1, %cst {dimension_numbers = #tpu.dot_dimension_numbers<[1], [0], [0], [1], [0, 0, 1, 1], [], []>} : vector<16x800xbf16>, vector<800x128xbf16>, vector<16x128xf32> -> vector<16x128xf32>
    %c0_3 = arith.constant 0 : index
    %c0_4 = arith.constant 0 : index
    %3 = vector.load %arg3[%c0_3, %c0_4] : memref<1x128xf32, #tpu.memory_space<vmem>>, vector<1x128xf32>
    %4 = vector.broadcast %3 : vector<1x128xf32> to vector<16x128xf32>
    %5 = arith.addf %2, %4 : vector<16x128xf32>
    %cst_5 = arith.constant 0.00999999977 : f32
    %6 = vector.broadcast %cst_5 : f32 to vector<16x128xf32>
    %7 = arith.mulf %6, %5 : vector<16x128xf32>
    %8 = arith.maximumf %5, %7 : vector<16x128xf32>
    %9 = arith.truncf %8 : vector<16x128xf32> to vector<16x128xbf16>
    %c0_6 = arith.constant 0 : index
    %c0_7 = arith.constant 0 : index
    %10 = vector.load %arg4[%c0_6, %c0_7] : memref<128x128xbf16, #tpu.memory_space<vmem>>, vector<128x128xbf16>
    %cst_8 = arith.constant dense<0.000000e+00> : vector<16x128xf32>
    %11 = tpu.matmul %9, %10, %cst_8 {dimension_numbers = #tpu.dot_dimension_numbers<[1], [0], [0], [1], [0, 0, 1, 1], [], []>} : vector<16x128xbf16>, vector<128x128xbf16>, vector<16x128xf32> -> vector<16x128xf32>
    %c0_9 = arith.constant 0 : index
    %c0_10 = arith.constant 0 : index
    %12 = vector.load %arg5[%c0_9, %c0_10] : memref<1x128xf32, #tpu.memory_space<vmem>>, vector<1x128xf32>
    %13 = vector.broadcast %12 : vector<1x128xf32> to vector<16x128xf32>
    %14 = arith.addf %11, %13 : vector<16x128xf32>
    %c0_11 = arith.constant 0 : index
    %c0_12 = arith.constant 0 : index
    %15 = vector.load %arg8[%c0_11, %c0_12] : memref<16x128xf32, #tpu.memory_space<vmem>>, vector<16x128xf32>
    tpu.vector_store %arg8[%c0_11, %c0_12], %14 {strides = array<i32>} : memref<16x128xf32, #tpu.memory_space<vmem>>, vector<16x128xf32>,
    %c0_13 = arith.constant 0 : index
    %c0_14 = arith.constant 0 : index
    %16 = vector.load %arg6[%c0_13, %c0_14] : memref<128x128xbf16, #tpu.memory_space<vmem>>, vector<128x128xbf16>
    %cst_15 = arith.constant dense<0.000000e+00> : vector<16x128xf32>
    %17 = tpu.matmul %9, %16, %cst_15 {dimension_numbers = #tpu.dot_dimension_numbers<[1], [0], [0], [1], [0, 0, 1, 1], [], []>} : vector<16x128xbf16>, vector<128x128xbf16>, vector<16x128xf32> -> vector<16x128xf32>
    %c0_16 = arith.constant 0 : index
    %c0_17 = arith.constant 0 : index
    %18 = vector.load %arg7[%c0_16, %c0_17] : memref<1x128xf32, #tpu.memory_space<vmem>>, vector<1x128xf32>
    %19 = vector.broadcast %18 : vector<1x128xf32> to vector<16x128xf32>
    %20 = arith.addf %17, %19 : vector<16x128xf32>
    %21 = arith.mulf %20, %20 : vector<16x128xf32>
    %cst_18 = arith.constant dense<0.000000e+00> : vector<16xf32>
    %22 = vector.multi_reduction <add>, %21, %cst_18 [1] : vector<16x128xf32> to vector<16xf32>
    %23 = vector.shape_cast %22 : vector<16xf32> to vector<16x1xf32>
    %cst_19 = arith.constant 1.000000e-24 : f32
    %24 = vector.broadcast %cst_19 : f32 to vector<16x1xf32>
    %25 = arith.maximumf %23, %24 : vector<16x1xf32>
    %26 = math.rsqrt %25 : vector<16x1xf32>
    %27 = vector.broadcast %26 : vector<16x1xf32> to vector<16x128xf32>
    %28 = arith.mulf %20, %27 : vector<16x128xf32>
    %c0_20 = arith.constant 0 : index
    %c0_21 = arith.constant 0 : index
    %29 = vector.load %arg9[%c0_20, %c0_21] : memref<16x128xf32, #tpu.memory_space<vmem>>, vector<16x128xf32>
    tpu.vector_store %arg9[%c0_20, %c0_21], %28 {strides = array<i32>} : memref<16x128xf32, #tpu.memory_space<vmem>>, vector<16x128xf32>,
    return
  }
  func.func @transform_0(%arg0: i32) -> (i32, i32) {
    %c0_i32 = arith.constant 0 : i32
    %c0_i32_0 = arith.constant 0 : i32
    return %arg0, %c0_i32 : i32, i32
  }
  func.func @transform_1(%arg0: i32) -> (i32, i32) {
    %c0_i32 = arith.constant 0 : i32
    %c0_i32_0 = arith.constant 0 : i32
    %c0_i32_1 = arith.constant 0 : i32
    return %c0_i32, %c0_i32_0 : i32, i32
  }
  func.func @transform_2(%arg0: i32) -> (i32, i32) {
    %c0_i32 = arith.constant 0 : i32
    %c0_i32_0 = arith.constant 0 : i32
    %c0_i32_1 = arith.constant 0 : i32
    return %c0_i32, %c0_i32_0 : i32, i32
  }
  func.func @transform_3(%arg0: i32) -> (i32, i32) {
    %c0_i32 = arith.constant 0 : i32
    %c0_i32_0 = arith.constant 0 : i32
    %c0_i32_1 = arith.constant 0 : i32
    return %c0_i32, %c0_i32_0 : i32, i32
  }
  func.func @transform_4(%arg0: i32) -> (i32, i32) {
    %c0_i32 = arith.constant 0 : i32
    %c0_i32_0 = arith.constant 0 : i32
    %c0_i32_1 = arith.constant 0 : i32
    return %c0_i32, %c0_i32_0 : i32, i32
  }
  func.func @transform_5(%arg0: i32) -> (i32, i32) {
    %c0_i32 = arith.constant 0 : i32
    %c0_i32_0 = arith.constant 0 : i32
    %c0_i32_1 = arith.constant 0 : i32
    return %c0_i32, %c0_i32_0 : i32, i32
  }
  func.func @transform_6(%arg0: i32) -> (i32, i32) {
    %c0_i32 = arith.constant 0 : i32
    %c0_i32_0 = arith.constant 0 : i32
    %c0_i32_1 = arith.constant 0 : i32
    return %c0_i32, %c0_i32_0 : i32, i32
  }
  func.func @transform_7(%arg0: i32) -> (i32, i32) {
    %c0_i32 = arith.constant 0 : i32
    %c0_i32_0 = arith.constant 0 : i32
    return %arg0, %c0_i32 : i32, i32
  }
  func.func @transform_8(%arg0: i32) -> (i32, i32) {
    %c0_i32 = arith.constant 0 : i32
    %c0_i32_0 = arith.constant 0 : i32
    return %arg0, %c0_i32 : i32, i32
  }
}

</mosaic_0001>

<bundles_post_ra>
// kernel: cnn_fmnist_forward.3
= control target key start
LH: loop header
LB: loop body
LE: loop exit
PB: predicated region body
PF: predicated region fallthrough
CT: control target
= control target key end

     0   :  { %s2628_s21 = smov 0   ;;  %s3194_s0 = inlined_call_operand.vmem [shape: bf16[512,25], index: 0, kind: input, shape index: {}]   ;;  %s3195_s1 = inlined_call_operand.vmem [shape: bf16[512,25], index: 1, kind: input, shape index: {}]   ;;  %s3196_s2 = inlined_call_operand.vmem [shape: bf16[512,25], index: 2, kind: input, shape index: {}]   ;;  %s3197_s3 = inlined_call_operand.vmem [shape: bf16[512,25], index: 3, kind: input, shape index: {}]   ;;  %s3198_s4 = inlined_call_operand.vmem [shape: bf16[25,16], index: 4, kind: input, shape index: {}]   ;;  %s3199_s5 = inlined_call_operand.vmem [shape: f32[1,16], index: 5, kind: input, shape index: {}]   ;;  %s3200_s6 = inlined_call_operand.vmem [shape: bf16[512,16], index: 6, kind: output, shape index: {}]  }
   0x1 LB: > { %s2081_s22 = sadd.s32 4294967295, %s2590_s21   ;;  %p2085_p0 = scmp.ge.s32.totalorder %s2590_s21, 1  ;;  %s2590_s21 = sphi %s2628_s21, %s16_s21  }
   0x2   : > { %p246_p1 = scmp.lt.s32.totalorder %s2590_s21, 3 }
   0x4   : > { %p247_p2 = pnand %p2085_p0, %p246_p1 }
   0x6   : > { %250 = sbr.rel (%p247_p2) target bundleno = 372 (0x174), region = 44 }
   0xd   : > { %v2518_v0 = vld [vmem:[%s3198_s4] sm:$0xff]   ;;  %vm498_vm0 = vcmask 1043456   ;;  %v2519_v1 = vld [vmem:[%s3198_s4 + $0x8] sm:$0x1f]   ;;  %vm499_vm1 = vcmask 1044480   ;;  %s2086_s27 = sshll.u32 %s2081_s22, 5 }
   0xe   : > { %2365 = vmatprep.subr.bf16.mxu0 %v2518_v0  ;;  %2401 = vmatprep.subr.bf16.mxu1 %v2518_v0  ;;  %v2592_v2 = vmov 65535   ;;  %p292_p3 = scmp.lt.s32.totalorder %s2086_s27, 63  ;;  %vm449_vm2 = vcmask 203776   ;;  %vm1956_vm3 = vcmask 125952  }
   0xf   : > { %2366 = vmatpush3.bf16.msra.mxu0 %v2518_v0  ;;  %2402 = vmatpush3.bf16.msra.mxu1 %v2518_v0  ;;  %v500_v3 = vsel %vm498_vm0, 4294967295, %v2592_v2 }
  0x10   : > { %v501_v4 = vsel %vm499_vm1, %v500_v3, 0  ;;  %s3285_s27 = smov (!%p292_p3, %s2086_s27), 63 }
  0x11   : > { %v503_v5 = vand.u32 %v2519_v1, %v501_v4  ;;  %s2642_s28 = sshll.u32 %s3285_s27, 2 }
  0x12   : > { %s2648_s7 = scalar_lea.vmem %s3194_s0, %s2642_s28  ;;  %s2654_s10 = scalar_lea.vmem %s3195_s1, %s2642_s28 }
  0x13   : > { %2367 = vmatprep.subr.bf16.mxu0 %v503_v5  ;;  %2403 = vmatprep.subr.bf16.mxu1 %v503_v5  ;;  %v2520_v6 = vld [vmem:[%s2648_s7] sm:$0xff]   ;;  %v2522_v8 = vld [vmem:[%s2648_s7 + $0x8] sm:$0xff]   ;;  %v2524_v10 = vld [vmem:[%s2648_s7 + $0x10] sm:$0xff]   ;;  %s2697_s13 = scalar_lea.vmem %s3196_s2, %s2642_s28  ;;  %s2704_s16 = scalar_lea.vmem %s3197_s3, %s2642_s28 }
  0x14   : > { %2368 = vmatpush3.bf16.msra.mxu0 %v503_v5  ;;  %2404 = vmatpush3.bf16.msra.mxu1 %v503_v5  ;;  %v2521_v7 = vld [vmem:[%s2654_s10] sm:$0xff]   ;;  %v2523_v9 = vld [vmem:[%s2654_s10 + $0x8] sm:$0xff]   ;;  %v2525_v11 = vld [vmem:[%s2654_s10 + $0x10] sm:$0xff]   ;;  %s3013_s22 = scalar_lea.vmem %s3200_s6, %s2642_s28 }
  0x15   : > { %2437 = vmatprep.subr.bf16.mxu0 %v2518_v0  ;;  %2473 = vmatprep.subr.bf16.mxu1 %v2518_v0  ;;  %v2526_v12 = vld [vmem:[%s2648_s7 + $0x18] sm:$0xff]   ;;  %v2528_v14 = vld [vmem:[%s2648_s7 + $0x20] sm:$0xff]   ;;  %v2530_v16 = vld [vmem:[%s2648_s7 + $0x28] sm:$0xff]  }
  0x16   : > { %2369 = vmatprep.mubr.msk.bf16.mxu0 %vm449_vm2, %v2520_v6  ;;  %2405 = vmatprep.mubr.msk.bf16.mxu1 %vm449_vm2, %v2521_v7  ;;  %v2527_v13 = vld [vmem:[%s2654_s10 + $0x18] sm:$0xff]   ;;  %v2529_v15 = vld [vmem:[%s2654_s10 + $0x20] sm:$0xff]   ;;  %v2531_v17 = vld [vmem:[%s2654_s10 + $0x28] sm:$0xff]  }
  0x17   : > { %2370 = vmatmul.mubr.msk.bf16.vlgmr.msra.gmra.mrb[0].mxu0 %vm449_vm2, %v2522_v8  ;;  %2406 = vmatmul.mubr.msk.bf16.vlgmr.msra.gmra.mrb[0].mxu1 %vm449_vm2, %v2523_v9  ;;  %v2532_v18 = vld [vmem:[%s2648_s7 + $0x30] sm:$0xff]   ;;  %v2534_v20 = vld [vmem:[%s2648_s7 + $0x38] sm:$0xff]   ;;  %v2536_v22 = vld [vmem:[%s2648_s7 + $0x40] sm:$0xff]  }
  0x18   : > { %2438 = vmatpush3.bf16.msra.mxu0 %v2518_v0  ;;  %2474 = vmatpush3.bf16.msra.mxu1 %v2518_v0  ;;  %v2533_v19 = vld [vmem:[%s2654_s10 + $0x30] sm:$0xff]   ;;  %v2535_v21 = vld [vmem:[%s2654_s10 + $0x38] sm:$0xff]   ;;  %v2537_v23 = vld [vmem:[%s2654_s10 + $0x40] sm:$0xff]  }
  0x19   : > { %2373 = vmatprep.mubr.msk.bf16.mxu0 %vm449_vm2, %v2524_v10  ;;  %2409 = vmatprep.mubr.msk.bf16.mxu1 %vm449_vm2, %v2525_v11  ;;  %v2538_v24 = vld [vmem:[%s2648_s7 + $0x48] sm:$0xff]   ;;  %v2540_v26 = vld [vmem:[%s2648_s7 + $0x50] sm:$0xff]   ;;  %v2542_v28 = vld [vmem:[%s2648_s7 + $0x58] sm:$0xff]  }
  0x1a   : > { %2439 = vmatprep.subr.bf16.mxu0 %v503_v5  ;;  %2475 = vmatprep.subr.bf16.mxu1 %v503_v5  ;;  %v2539_v25 = vld [vmem:[%s2654_s10 + $0x48] sm:$0xff]   ;;  %v2541_v27 = vld [vmem:[%s2654_s10 + $0x50] sm:$0xff]   ;;  %v2543_v29 = vld [vmem:[%s2654_s10 + $0x58] sm:$0xff]  }
  0x1b   : > { %v2544_v30 = vld [vmem:[%s2648_s7 + $0x60] sm:$0xff]   ;;  %v2546_v32 = vld [vmem:[%s2648_s7 + $0x68] sm:$0xff]   ;;  %v2548_v34 = vld [vmem:[%s2648_s7 + $0x70] sm:$0xff]  }
  0x1c   : > { %2440 = vmatpush3.bf16.msra.mxu0 %v503_v5  ;;  %2476 = vmatpush3.bf16.msra.mxu1 %v503_v5  ;;  %v2545_v31 = vld [vmem:[%s2654_s10 + $0x60] sm:$0xff]   ;;  %v2547_v33 = vld [vmem:[%s2654_s10 + $0x68] sm:$0xff]   ;;  %v2549_v35 = vld [vmem:[%s2654_s10 + $0x70] sm:$0xff]  }
  0x1d   : > { %v2550_v36 = vld [vmem:[%s2648_s7 + $0x78] sm:$0xff]   ;;  %v2552_v38 = vld [vmem:[%s2697_s13] sm:$0xff]   ;;  %v2554_v40 = vld [vmem:[%s2697_s13 + $0x8] sm:$0xff]  }
  0x1e   : > { %v2551_v37 = vld [vmem:[%s2654_s10 + $0x78] sm:$0xff]   ;;  %v2553_v39 = vld [vmem:[%s2704_s16] sm:$0xff]   ;;  %v2555_v41 = vld [vmem:[%s2704_s16 + $0x8] sm:$0xff]  }
  0x1f   : > { %2374 = vmatmul.mubr.msk.bf16.gmra.mrb[4].mxu0 %vm449_vm2, %v2526_v12  ;;  %2410 = vmatmul.mubr.msk.bf16.gmra.mrb[4].mxu1 %vm449_vm2, %v2527_v13  ;;  %v2556_v42 = vld [vmem:[%s2697_s13 + $0x10] sm:$0xff]   ;;  %v2558_v44 = vld [vmem:[%s2697_s13 + $0x18] sm:$0xff]   ;;  %v2560_v46 = vld [vmem:[%s2697_s13 + $0x20] sm:$0xff]  }
  0x20   : > { %2377 = vmatprep.mubr.msk.bf16.mxu0 %vm449_vm2, %v2528_v14  ;;  %2413 = vmatprep.mubr.msk.bf16.mxu1 %vm449_vm2, %v2529_v15  ;;  %v2557_v43 = vld [vmem:[%s2704_s16 + $0x10] sm:$0xff]   ;;  %v2559_v45 = vld [vmem:[%s2704_s16 + $0x18] sm:$0xff]   ;;  %v2561_v47 = vld [vmem:[%s2704_s16 + $0x20] sm:$0xff]  }
  0x21   : > { %v2562_v48 = vld [vmem:[%s2697_s13 + $0x28] sm:$0xff]   ;;  %v2564_v50 = vld [vmem:[%s2697_s13 + $0x30] sm:$0xff]   ;;  %v2566_v52 = vld [vmem:[%s2697_s13 + $0x38] sm:$0xff]  }
  0x22   : > { %v2563_v49 = vld [vmem:[%s2704_s16 + $0x28] sm:$0xff]   ;;  %v2565_v51 = vld [vmem:[%s2704_s16 + $0x30] sm:$0xff]   ;;  %v2567_v53 = vld [vmem:[%s2704_s16 + $0x38] sm:$0xff]  }
  0x23   : > { %v2568_v54 = vld [vmem:[%s2697_s13 + $0x40] sm:$0xff]   ;;  %v2570_v56 = vld [vmem:[%s2697_s13 + $0x48] sm:$0xff]   ;;  %v2572_v58 = vld [vmem:[%s2697_s13 + $0x50] sm:$0xff]  }
  0x24   : > { %v2569_v55 = vld [vmem:[%s2704_s16 + $0x40] sm:$0xff]   ;;  %v2571_v57 = vld [vmem:[%s2704_s16 + $0x48] sm:$0xff]   ;;  %v2573_v59 = vld [vmem:[%s2704_s16 + $0x50] sm:$0xff]  }
  0x25   : > { %v2574_v60 = vld [vmem:[%s2697_s13 + $0x58] sm:$0xff]   ;;  %v2576_v62 = vld [vmem:[%s2697_s13 + $0x60] sm:$0xff]   ;;  %v2578_v0 = vld [vmem:[%s2697_s13 + $0x68] sm:$0xff]  }
  0x26   : > { %v2575_v61 = vld [vmem:[%s2704_s16 + $0x58] sm:$0xff]   ;;  %v2577_v63 = vld [vmem:[%s2704_s16 + $0x60] sm:$0xff]   ;;  %v2579_v1 = vld [vmem:[%s2704_s16 + $0x68] sm:$0xff]  }
  0x27   : > { %2378 = vmatmul.mubr.msk.bf16.gmra.mrb[8].mxu0 %vm449_vm2, %v2530_v16  ;;  %2414 = vmatmul.mubr.msk.bf16.gmra.mrb[8].mxu1 %vm449_vm2, %v2531_v17  ;;  %v2580_v2 = vld [vmem:[%s2697_s13 + $0x70] sm:$0xff]   ;;  %v2582_v4 = vld [vmem:[%s2697_s13 + $0x78] sm:$0xff]  }
  0x28   : > { %2381 = vmatprep.mubr.msk.bf16.mxu0 %vm449_vm2, %v2532_v18  ;;  %2417 = vmatprep.mubr.msk.bf16.mxu1 %vm449_vm2, %v2533_v19  ;;  %v2581_v3 = vld [vmem:[%s2704_s16 + $0x70] sm:$0xff]   ;;  %v2583_v5 = vld [vmem:[%s2704_s16 + $0x78] sm:$0xff]  }
  0x2f   : > { %2382 = vmatmul.mubr.msk.bf16.gmra.mrb[12].mxu0 %vm449_vm2, %v2534_v20  ;;  %2418 = vmatmul.mubr.msk.bf16.gmra.mrb[12].mxu1 %vm449_vm2, %v2535_v21 }
  0x30   : > { %2385 = vmatprep.mubr.msk.bf16.mxu0 %vm449_vm2, %v2536_v22  ;;  %2421 = vmatprep.mubr.msk.bf16.mxu1 %vm449_vm2, %v2537_v23 }
  0x37   : > { %2386 = vmatmul.mubr.msk.bf16.gmra.mrb[16].mxu0 %vm449_vm2, %v2538_v24  ;;  %2422 = vmatmul.mubr.msk.bf16.gmra.mrb[16].mxu1 %vm449_vm2, %v2539_v25 }
  0x38   : > { %2389 = vmatprep.mubr.msk.bf16.mxu0 %vm449_vm2, %v2540_v26  ;;  %2425 = vmatprep.mubr.msk.bf16.mxu1 %vm449_vm2, %v2541_v27 }
  0x3f   : > { %2390 = vmatmul.mubr.msk.bf16.gmra.mrb[20].mxu0 %vm449_vm2, %v2542_v28  ;;  %2426 = vmatmul.mubr.msk.bf16.gmra.mrb[20].mxu1 %vm449_vm2, %v2543_v29 }
  0x40   : > { %2393 = vmatprep.mubr.msk.bf16.mxu0 %vm449_vm2, %v2544_v30  ;;  %2429 = vmatprep.mubr.msk.bf16.mxu1 %vm449_vm2, %v2545_v31 }
  0x47   : > { %2394 = vmatmul.mubr.msk.bf16.gmra.mrb[24].mxu0 %vm449_vm2, %v2546_v32  ;;  %2430 = vmatmul.mubr.msk.bf16.gmra.mrb[24].mxu1 %vm449_vm2, %v2547_v33 }
  0x48   : > { %2397 = vmatprep.mubr.msk.bf16.mxu0 %vm449_vm2, %v2548_v34  ;;  %2433 = vmatprep.mubr.msk.bf16.mxu1 %vm449_vm2, %v2549_v35 }
  0x4f   : > { %2398 = vmatmul.mubr.msk.bf16.gmra.mrb[28].mxu0 %vm449_vm2, %v2550_v36  ;;  %2434 = vmatmul.mubr.msk.bf16.gmra.mrb[28].mxu1 %vm449_vm2, %v2551_v37 }
  0x50   : > { %2441 = vmatprep.mubr.msk.bf16.mxu0 %vm449_vm2, %v2552_v38  ;;  %2477 = vmatprep.mubr.msk.bf16.mxu1 %vm449_vm2, %v2553_v39 }
  0x57   : > { %2442 = vmatmul.mubr.msk.bf16.vlgmr.msra.gmra.mrb[32].mxu0 %vm449_vm2, %v2554_v40  ;;  %2478 = vmatmul.mubr.msk.bf16.vlgmr.msra.gmra.mrb[32].mxu1 %vm449_vm2, %v2555_v41 }
  0x58   : > { %2445 = vmatprep.mubr.msk.bf16.mxu0 %vm449_vm2, %v2556_v42  ;;  %2481 = vmatprep.mubr.msk.bf16.mxu1 %vm449_vm2, %v2557_v43 }
  0x5f   : > { %2446 = vmatmul.mubr.msk.bf16.gmra.mrb[36].mxu0 %vm449_vm2, %v2558_v44  ;;  %2482 = vmatmul.mubr.msk.bf16.gmra.mrb[36].mxu1 %vm449_vm2, %v2559_v45  ;;  %v2991_v45 = vld [vmem:[%s3199_s5] ss:$0 sm:$0xff] }
  0x60   : > { %2449 = vmatprep.mubr.msk.bf16.mxu0 %vm449_vm2, %v2560_v46  ;;  %2485 = vmatprep.mubr.msk.bf16.mxu1 %vm449_vm2, %v2561_v47 }
  0x67   : > { %2450 = vmatmul.mubr.msk.bf16.gmra.mrb[40].mxu0 %vm449_vm2, %v2562_v48  ;;  %2486 = vmatmul.mubr.msk.bf16.gmra.mrb[40].mxu1 %vm449_vm2, %v2563_v49 }
  0x68   : > { %2453 = vmatprep.mubr.msk.bf16.mxu0 %vm449_vm2, %v2564_v50  ;;  %2489 = vmatprep.mubr.msk.bf16.mxu1 %vm449_vm2, %v2565_v51 }
  0x6f   : > { %2454 = vmatmul.mubr.msk.bf16.gmra.mrb[44].mxu0 %vm449_vm2, %v2566_v52  ;;  %2490 = vmatmul.mubr.msk.bf16.gmra.mrb[44].mxu1 %vm449_vm2, %v2567_v53 }
  0x70   : > { %2457 = vmatprep.mubr.msk.bf16.mxu0 %vm449_vm2, %v2568_v54  ;;  %2493 = vmatprep.mubr.msk.bf16.mxu1 %vm449_vm2, %v2569_v55 }
  0x77   : > { %2458 = vmatmul.mubr.msk.bf16.gmra.mrb[48].mxu0 %vm449_vm2, %v2570_v56  ;;  %2494 = vmatmul.mubr.msk.bf16.gmra.mrb[48].mxu1 %vm449_vm2, %v2571_v57 }
  0x78   : > { %2461 = vmatprep.mubr.msk.bf16.mxu0 %vm449_vm2, %v2572_v58  ;;  %2497 = vmatprep.mubr.msk.bf16.mxu1 %vm449_vm2, %v2573_v59 }
  0x7f   : > { %2462 = vmatmul.mubr.msk.bf16.gmra.mrb[52].mxu0 %vm449_vm2, %v2574_v60  ;;  %2498 = vmatmul.mubr.msk.bf16.gmra.mrb[52].mxu1 %vm449_vm2, %v2575_v61 }
  0x80   : > { %2465 = vmatprep.mubr.msk.bf16.mxu0 %vm449_vm2, %v2576_v62  ;;  %2501 = vmatprep.mubr.msk.bf16.mxu1 %vm449_vm2, %v2577_v63 }
  0x87   : > { %2466 = vmatmul.mubr.msk.bf16.gmra.mrb[56].mxu0 %vm449_vm2, %v2578_v0  ;;  %2502 = vmatmul.mubr.msk.bf16.gmra.mrb[56].mxu1 %vm449_vm2, %v2579_v1 }
  0x88   : > { %2469 = vmatprep.mubr.msk.bf16.mxu0 %vm449_vm2, %v2580_v2  ;;  %2505 = vmatprep.mubr.msk.bf16.mxu1 %vm449_vm2, %v2581_v3 }
  0x8f   : > { %2470 = vmatmul.mubr.msk.bf16.gmra.mrb[60].mxu0 %vm449_vm2, %v2582_v4  ;;  %2506 = vmatmul.mubr.msk.bf16.gmra.mrb[60].mxu1 %vm449_vm2, %v2583_v5 }
  0xea   : > { %v2796_v6 = vpop.f32.mrb[0].mxu0  ;;  %v2798_v7 = vpop.f32.mrb[0].mxu1 }
  0xeb   : > { %v2800_v8 = vpop.f32.mrb[1].mxu0  ;;  %v2804_v10 = vpop.f32.mrb[1].mxu1  ;;  %v3235_v21 = vmax.f32 %v2796_v6, %v2798_v7 }
  0xec   : > { %v2806_v11 = vpop.f32.mrb[2].mxu0  ;;  %v2810_v13 = vpop.f32.mrb[2].mxu1 }
  0xed   : > { %v2812_v14 = vpop.f32.mrb[3].mxu0  ;;  %v2816_v16 = vpop.f32.mrb[3].mxu1 }
  0xee   : > { %v3238_v6 = vmax.f32 %v2812_v14, %v2816_v16 }
  0xf2   : > { %v2820_v18 = vpop.f32.mrb[4].mxu0  ;;  %v2822_v19 = vpop.f32.mrb[4].mxu1 }
  0xf3   : > { %v2824_v20 = vpop.f32.mrb[5].mxu0  ;;  %v2828_v22 = vpop.f32.mrb[5].mxu1 }
  0xf4   : > { %v2830_v23 = vpop.f32.mrb[6].mxu0  ;;  %v2834_v25 = vpop.f32.mrb[6].mxu1 }
  0xf5   : > { %v2836_v26 = vpop.f32.mrb[7].mxu0  ;;  %v2840_v28 = vpop.f32.mrb[7].mxu1 }
  0xfa   : > { %v2844_v30 = vpop.f32.mrb[8].mxu0  ;;  %v2846_v31 = vpop.f32.mrb[8].mxu1 }
  0xfb   : > { %v2848_v32 = vpop.f32.mrb[9].mxu0  ;;  %v2852_v34 = vpop.f32.mrb[9].mxu1 }
  0xfc   : > { %v2854_v35 = vpop.f32.mrb[10].mxu0  ;;  %v2858_v37 = vpop.f32.mrb[10].mxu1 }
  0xfd   : > { %v2860_v38 = vpop.f32.mrb[11].mxu0  ;;  %v2864_v40 = vpop.f32.mrb[11].mxu1 }
 0x102   : > { %v2868_v42 = vpop.f32.mrb[12].mxu0  ;;  %v2870_v43 = vpop.f32.mrb[12].mxu1 }
 0x103   : > { %v2872_v44 = vpop.f32.mrb[13].mxu0  ;;  %v2876_v46 = vpop.f32.mrb[13].mxu1 }
 0x104   : > { %v2878_v47 = vpop.f32.mrb[14].mxu0  ;;  %v2882_v49 = vpop.f32.mrb[14].mxu1 }
 0x105   : > { %v2884_v50 = vpop.f32.mrb[15].mxu0  ;;  %v2888_v52 = vpop.f32.mrb[15].mxu1 }
 0x10a   : > { %v2892_v54 = vpop.f32.mrb[16].mxu0  ;;  %v2894_v55 = vpop.f32.mrb[16].mxu1 }
 0x10b   : > { %v2896_v56 = vpop.f32.mrb[17].mxu0  ;;  %v2900_v58 = vpop.f32.mrb[17].mxu1 }
 0x10c   : > { %v2902_v59 = vpop.f32.mrb[18].mxu0  ;;  %v2906_v61 = vpop.f32.mrb[18].mxu1 }
 0x10d   : > { %v2908_v62 = vpop.f32.mrb[19].mxu0  ;;  %v2912_v0 = vpop.f32.mrb[19].mxu1 }
 0x112   : > { %v2916_v2 = vpop.f32.mrb[20].mxu0  ;;  %v2918_v3 = vpop.f32.mrb[20].mxu1 }
 0x113   : > { %v2920_v4 = vpop.f32.mrb[21].mxu0  ;;  %v2924_v60 = vpop.f32.mrb[21].mxu1 }
 0x114   : > { %v2926_v57 = vpop.f32.mrb[22].mxu0  ;;  %v2930_v53 = vpop.f32.mrb[22].mxu1 }
 0x115   : > { %v2932_v51 = vpop.f32.mrb[23].mxu0  ;;  %v2936_v48 = vpop.f32.mrb[23].mxu1 }
 0x116   : > { %3218 = vst [vmem:[#allocation2_spill] sm:$0xff] %v2936_v48  ;;  %v3237_v48 = vmax.f32 %v2806_v11, %v2810_v13 }
 0x11a   : > { %v2940_v5 = vpop.f32.mrb[24].mxu0  ;;  %v2942_v41 = vpop.f32.mrb[24].mxu1 }
 0x11b   : > { %3219 = vst [vmem:[#allocation3_spill] sm:$0xff] %v2940_v5  ;;  %3220 = vst [vmem:[#allocation4_spill] sm:$0xff] %v2942_v41  ;;  %v2944_v39 = vpop.f32.mrb[25].mxu0  ;;  %v2948_v36 = vpop.f32.mrb[25].mxu1 }
 0x11c   : > { %3221 = vst [vmem:[#allocation5_spill] sm:$0xff] %v2944_v39  ;;  %3222 = vst [vmem:[#allocation6_spill] sm:$0xff] %v2948_v36  ;;  %v2950_v33 = vpop.f32.mrb[26].mxu0  ;;  %v2954_v29 = vpop.f32.mrb[26].mxu1 }
 0x11d   : > { %3223 = vst [vmem:[#allocation7_spill] sm:$0xff] %v2950_v33  ;;  %3224 = vst [vmem:[#allocation8_spill] sm:$0xff] %v2954_v29  ;;  %v2956_v27 = vpop.f32.mrb[27].mxu0  ;;  %v2960_v24 = vpop.f32.mrb[27].mxu1 }
 0x11e   : > { %3225 = vst [vmem:[#allocation9_spill] sm:$0xff] %v2956_v27  ;;  %3226 = vst [vmem:[#allocation10_spill] sm:$0xff] %v2960_v24 }
 0x122   : > { %v2964_v63 = vpop.f32.mrb[28].mxu0  ;;  %v2966_v17 = vpop.f32.mrb[28].mxu1 }
 0x123   : > { %3227 = vst [vmem:[#allocation11_spill] sm:$0xff] %v2964_v63  ;;  %3228 = vst [vmem:[#allocation12_spill] sm:$0xff] %v2966_v17  ;;  %v2968_v15 = vpop.f32.mrb[29].mxu0  ;;  %v2972_v12 = vpop.f32.mrb[29].mxu1 }
 0x124   : > { %3229 = vst [vmem:[#allocation13_spill] sm:$0xff] %v2968_v15  ;;  %3230 = vst [vmem:[#allocation14_spill] sm:$0xff] %v2972_v12  ;;  %v2974_v9 = vpop.f32.mrb[30].mxu0  ;;  %v2978_v29 = vpop.f32.mrb[30].mxu1 }
 0x125   : > { %3231 = vst [vmem:[#allocation15_spill] sm:$0xff] %v2974_v9  ;;  %3232 = vst [vmem:[#allocation16_spill] sm:$0xff] %v2978_v29  ;;  %v2980_v33 = vpop.f32.mrb[31].mxu0  ;;  %v2984_v24 = vpop.f32.mrb[31].mxu1 }
 0x126   : > { %3233 = vst [vmem:[#allocation17_spill] sm:$0xff] %v2980_v33  ;;  %3234 = vst [vmem:[#allocation18_spill] sm:$0xff] %v2984_v24  ;;  %v3236_v24 = vmax.f32 %v2800_v8, %v2804_v10 }
 0x12a   : > { %v2443_v1 = vpop.f32.mrb[32].mxu0  ;;  %v2479_v17 = vpop.f32.mrb[32].mxu1 }
 0x12b   : > { %v1181_v63 = vpop.f32.mrb[33].mxu0  ;;  %v1663_v36 = vmax.f32 %v2443_v1, %v2479_v17  ;;  %v1502_v39 = vpop.f32.mrb[33].mxu1 }
 0x12c   : > { %v2444_v41 = vpop.f32.mrb[34].mxu0  ;;  %v1661_v12 = vmax.f32 %v1181_v63, %v1502_v39  ;;  %v2480_v15 = vpop.f32.mrb[34].mxu1 }
 0x12d   : > { %v1184_v5 = vpop.f32.mrb[35].mxu0  ;;  %v1695_v29 = vmax.f32 %v3235_v21, %v1663_v36  ;;  %v1664_v9 = vmax.f32 %v2444_v41, %v2480_v15  ;;  %v1505_v27 = vpop.f32.mrb[35].mxu1 }
 0x12e   : > { %v1693_v17 = vmax.f32 %v3236_v24, %v1661_v12  ;;  %v1662_v1 = vmax.f32 %v1184_v5, %v1505_v27 }
 0x12f   : > { %v1734_v33 = vadd.f32 %v2991_v45, %v1695_v29  ;;  %v1696_v39 = vmax.f32 %v3237_v48, %v1664_v9 }
 0x130   : > { %v1732_v63 = vadd.f32 %v2991_v45, %v1693_v17  ;;  %v1694_v7 = vmax.f32 %v3238_v6, %v1662_v1 }
 0x131   : > { %v1766_v15 = vmul.f32 0.01, %v1734_v33  ;;  %v1735_v21 = vadd.f32 %v2991_v45, %v1696_v39 }
 0x132   : > { %v2447_v36 = vpop.f32.mrb[36].mxu0  ;;  %v1764_v8 = vmul.f32 0.01, %v1732_v63  ;;  %v1733_v10 = vadd.f32 %v2991_v45, %v1694_v7  ;;  %v2483_v12 = vpop.f32.mrb[36].mxu1 }
 0x133   : > { %v1197_v24 = vpop.f32.mrb[37].mxu0  ;;  %v1798_v27 = vmax.f32 %v1734_v33, %v1766_v15  ;;  %v1767_v29 = vmul.f32 0.01, %v1735_v21  ;;  %v1667_v11 = vmax.f32 %v2447_v36, %v2483_v12  ;;  %v1518_v13 = vpop.f32.mrb[37].mxu1  ;;  %v3239_v33 = vmax.f32 %v2820_v18, %v2822_v19 }
 0x134   : > { %v2448_v9 = vpop.f32.mrb[38].mxu0  ;;  %v1796_v14 = vmax.f32 %v1732_v63, %v1764_v8  ;;  %v1765_v16 = vmul.f32 0.01, %v1733_v10  ;;  %v1665_v41 = vmax.f32 %v1197_v24, %v1518_v13  ;;  %v2484_v48 = vpop.f32.mrb[38].mxu1  ;;  %v3240_v63 = vmax.f32 %v2824_v20, %v2828_v22 }
 0x135   : > { %v1200_v5 = vpop.f32.mrb[39].mxu0  ;;  %v2263_v17 = vpack.c.bf16 %v1798_v27, %v1798_v27  ;;  %v1799_v1 = vmax.f32 %v1735_v21, %v1767_v29  ;;  %v1699_v39 = vmax.f32 %v3239_v33, %v1667_v11  ;;  %v1668_v6 = vmax.f32 %v2448_v9, %v2484_v48  ;;  %v1521_v7 = vpop.f32.mrb[39].mxu1 }
 0x136   : > { %v2261_v15 = vpack.c.bf16 %v1796_v14, %v1796_v14  ;;  %v1797_v36 = vmax.f32 %v1733_v10, %v1765_v16  ;;  %v1697_v8 = vmax.f32 %v3240_v63, %v1665_v41  ;;  %v1666_v12 = vmax.f32 %v1200_v5, %v1521_v7 }
 0x137   : > { %1959 = vst.msk [vmem:[%s3013_s22 + $0x8] sm:$0xf] %vm1956_vm3, %v2263_v17  ;;  %v2264_v24 = vpack.c.bf16 %v1799_v1, %v1799_v1  ;;  %v1738_v21 = vadd.f32 %v2991_v45, %v1699_v39  ;;  %v3241_v18 = vmax.f32 %v2830_v23, %v2834_v25  ;;  %v3242_v10 = vmax.f32 %v2836_v26, %v2840_v28 }
 0x138   : > { %1957 = vst.msk [vmem:[%s3013_s22] sm:$0xf] %vm1956_vm3, %v2261_v15  ;;  %v2262_v27 = vpack.c.bf16 %v1797_v36, %v1797_v36  ;;  %v1736_v29 = vadd.f32 %v2991_v45, %v1697_v8  ;;  %v3243_v15 = vmax.f32 %v2844_v30, %v2846_v31  ;;  %v3245_v30 = vmax.f32 %v2854_v35, %v2858_v37 }
 0x139   : > { %v1700_v19 = vmax.f32 %v3241_v18, %v1668_v6  ;;  %v1698_v20 = vmax.f32 %v3242_v10, %v1666_v12  ;;  %1960 = vst.msk [vmem:[%s3013_s22 + $0xc] sm:$0xf] %vm1956_vm3, %v2264_v24  ;;  %v1770_v22 = vmul.f32 0.01, %v1738_v21 }
 0x13a   : > { %v2451_v13 = vpop.f32.mrb[40].mxu0  ;;  %1958 = vst.msk [vmem:[%s3013_s22 + $0x4] sm:$0xf] %vm1956_vm3, %v2262_v27  ;;  %v1768_v9 = vmul.f32 0.01, %v1736_v29  ;;  %v2487_v25 = vpop.f32.mrb[40].mxu1 }
 0x13b   : > { %v1739_v11 = vadd.f32 %v2991_v45, %v1700_v19  ;;  %v1737_v23 = vadd.f32 %v2991_v45, %v1698_v20  ;;  %v1213_v14 = vpop.f32.mrb[41].mxu0  ;;  %v1802_v16 = vmax.f32 %v1738_v21, %v1770_v22  ;;  %v1671_v48 = vmax.f32 %v2451_v13, %v2487_v25  ;;  %v1534_v5 = vpop.f32.mrb[41].mxu1 }
 0x13c   : > { %v2452_v26 = vpop.f32.mrb[42].mxu0  ;;  %v1800_v28 = vmax.f32 %v1736_v29, %v1768_v9  ;;  %v1669_v1 = vmax.f32 %v1213_v14, %v1534_v5  ;;  %v2488_v33 = vpop.f32.mrb[42].mxu1  ;;  %v3244_v21 = vmax.f32 %v2848_v32, %v2852_v34  ;;  %v3246_v22 = vmax.f32 %v2860_v38, %v2864_v40 }
 0x13d   : > { %v1771_v41 = vmul.f32 0.01, %v1739_v11  ;;  %v1769_v17 = vmul.f32 0.01, %v1737_v23  ;;  %v1216_v39 = vpop.f32.mrb[43].mxu0  ;;  %v2267_v6 = vpack.c.bf16 %v1802_v16, %v1802_v16  ;;  %v1703_v36 = vmax.f32 %v3243_v15, %v1671_v48  ;;  %v1537_v8 = vpop.f32.mrb[43].mxu1 }
 0x13e   : > { %v1672_v63 = vmax.f32 %v2452_v26, %v2488_v33  ;;  %v2265_v12 = vpack.c.bf16 %v1800_v28, %v1800_v28  ;;  %v1701_v18 = vmax.f32 %v3244_v21, %v1669_v1  ;;  %v1670_v19 = vmax.f32 %v1216_v39, %v1537_v8 }
 0x13f   : > { %v1803_v7 = vmax.f32 %v1739_v11, %v1771_v41  ;;  %v1801_v24 = vmax.f32 %v1737_v23, %v1769_v17  ;;  %1963 = vst.msk [vmem:[%s3013_s22 + $0x18] sm:$0xf] %vm1956_vm3, %v2267_v6  ;;  %v1742_v29 = vadd.f32 %v2991_v45, %v1703_v36  ;;  %v3247_v33 = vmax.f32 %v2868_v42, %v2870_v43 }
 0x140   : > { %v1704_v31 = vmax.f32 %v3245_v30, %v1672_v63  ;;  %1961 = vst.msk [vmem:[%s3013_s22 + $0x10] sm:$0xf] %vm1956_vm3, %v2265_v12  ;;  %v1740_v20 = vadd.f32 %v2991_v45, %v1701_v18  ;;  %v1702_v32 = vmax.f32 %v3246_v22, %v1670_v19  ;;  %v3248_v63 = vmax.f32 %v2872_v44, %v2876_v46 }
 0x141   : > { %v2268_v27 = vpack.c.bf16 %v1803_v7, %v1803_v7  ;;  %v2266_v10 = vpack.c.bf16 %v1801_v24, %v1801_v24  ;;  %v1774_v34 = vmul.f32 0.01, %v1742_v29  ;;  %v3249_v42 = vmax.f32 %v2878_v47, %v2882_v49 }
 0x142   : > { %v1743_v11 = vadd.f32 %v2991_v45, %v1704_v31  ;;  %v2455_v13 = vpop.f32.mrb[44].mxu0  ;;  %v1772_v9 = vmul.f32 0.01, %v1740_v20  ;;  %v1741_v35 = vadd.f32 %v2991_v45, %v1702_v32  ;;  %v2491_v37 = vpop.f32.mrb[44].mxu1 }
 0x143   : > { %1964 = vst.msk [vmem:[%s3013_s22 + $0x1c] sm:$0xf] %vm1956_vm3, %v2268_v27  ;;  %1962 = vst.msk [vmem:[%s3013_s22 + $0x14] sm:$0xf] %vm1956_vm3, %v2266_v10  ;;  %v1229_v23 = vpop.f32.mrb[45].mxu0  ;;  %v1806_v25 = vmax.f32 %v1742_v29, %v1774_v34  ;;  %v1675_v16 = vmax.f32 %v2455_v13, %v2491_v37  ;;  %v1550_v41 = vpop.f32.mrb[45].mxu1  ;;  %v3250_v27 = vmax.f32 %v2884_v50, %v2888_v52 }
 0x144   : > { %v1775_v14 = vmul.f32 0.01, %v1743_v11  ;;  %v2456_v38 = vpop.f32.mrb[46].mxu0  ;;  %v1804_v40 = vmax.f32 %v1740_v20, %v1772_v9  ;;  %v1773_v48 = vmul.f32 0.01, %v1741_v35  ;;  %v1673_v5 = vmax.f32 %v1229_v23, %v1550_v41  ;;  %v2492_v26 = vpop.f32.mrb[46].mxu1 }
 0x145   : > { %v1232_v28 = vpop.f32.mrb[47].mxu0  ;;  %v2271_v17 = vpack.c.bf16 %v1806_v25, %v1806_v25  ;;  %v1707_v39 = vmax.f32 %v3247_v33, %v1675_v16  ;;  %v1676_v6 = vmax.f32 %v2456_v38, %v2492_v26  ;;  %v1553_v7 = vpop.f32.mrb[47].mxu1  ;;  %v3251_v25 = vmax.f32 %v2892_v54, %v2894_v55 }
 0x146   : > { %v1807_v1 = vmax.f32 %v1743_v11, %v1775_v14  ;;  %v2269_v15 = vpack.c.bf16 %v1804_v40, %v1804_v40  ;;  %v1805_v36 = vmax.f32 %v1741_v35, %v1773_v48  ;;  %v1705_v8 = vmax.f32 %v3248_v63, %v1673_v5 }
 0x147   : > { %v1674_v12 = vmax.f32 %v1232_v28, %v1553_v7  ;;  %1967 = vst.msk [vmem:[%s3013_s22 + $0x28] sm:$0xf] %vm1956_vm3, %v2271_v17  ;;  %v1746_v21 = vadd.f32 %v2991_v45, %v1707_v39  ;;  %v1708_v43 = vmax.f32 %v3249_v42, %v1676_v6  ;;  %v3252_v48 = vmax.f32 %v2896_v56, %v2900_v58 }
 0x148   : > { %v2272_v24 = vpack.c.bf16 %v1807_v1, %v1807_v1  ;;  %1965 = vst.msk [vmem:[%s3013_s22 + $0x20] sm:$0xf] %vm1956_vm3, %v2269_v15  ;;  %v2270_v18 = vpack.c.bf16 %v1805_v36, %v1805_v36  ;;  %v1744_v19 = vadd.f32 %v2991_v45, %v1705_v8  ;;  %v3253_v54 = vmax.f32 %v2902_v59, %v2906_v61 }
 0x149   : > { %v1706_v44 = vmax.f32 %v3250_v27, %v1674_v12  ;;  %v1778_v46 = vmul.f32 0.01, %v1746_v21  ;;  %v1747_v29 = vadd.f32 %v2991_v45, %v1708_v43  ;;  %v3254_v39 = vmax.f32 %v2908_v62, %v2912_v0 }
 0x14a   : > { %1968 = vst.msk [vmem:[%s3013_s22 + $0x2c] sm:$0xf] %vm1956_vm3, %v2272_v24  ;;  %v2459_v30 = vpop.f32.mrb[48].mxu0  ;;  %1966 = vst.msk [vmem:[%s3013_s22 + $0x24] sm:$0xf] %vm1956_vm3, %v2270_v18  ;;  %v2495_v49 = vpop.f32.mrb[48].mxu1 }
 0x14b   : > { %v1776_v31 = vmul.f32 0.01, %v1744_v19  ;;  %v1745_v47 = vadd.f32 %v2991_v45, %v1706_v44  ;;  %v1245_v10 = vpop.f32.mrb[49].mxu0  ;;  %v1810_v20 = vmax.f32 %v1746_v21, %v1778_v46  ;;  %v1779_v22 = vmul.f32 0.01, %v1747_v29  ;;  %v1566_v34 = vpop.f32.mrb[49].mxu1 }
 0x14c   : > { %v1679_v32 = vmax.f32 %v2459_v30, %v2495_v49  ;;  %v2460_v50 = vpop.f32.mrb[50].mxu0  ;;  %v1677_v13 = vmax.f32 %v1245_v10, %v1566_v34  ;;  %v2496_v9 = vpop.f32.mrb[50].mxu1  ;;  %v3255_v44 = vmax.f32 %v2916_v2, %v2918_v3  ;;  %v3256_v49 = vmax.f32 %v2920_v4, %v2924_v60 }
 0x14d   : > { %v1808_v52 = vmax.f32 %v1744_v19, %v1776_v31  ;;  %v1777_v11 = vmul.f32 0.01, %v1745_v47  ;;  %v1248_v35 = vpop.f32.mrb[51].mxu0  ;;  %v2275_v37 = vpack.c.bf16 %v1810_v20, %v1810_v20  ;;  %v1811_v23 = vmax.f32 %v1747_v29, %v1779_v22  ;;  %v1569_v41 = vpop.f32.mrb[51].mxu1 }
 0x14e   : > { %v1711_v14 = vmax.f32 %v3251_v25, %v1679_v32  ;;  %v1680_v16 = vmax.f32 %v2460_v50, %v2496_v9  ;;  %v1709_v5 = vmax.f32 %v3252_v48, %v1677_v13  ;;  %v1678_v26 = vmax.f32 %v1248_v35, %v1569_v41 }
 0x14f   : > { %v2273_v38 = vpack.c.bf16 %v1808_v52, %v1808_v52  ;;  %v1809_v40 = vmax.f32 %v1745_v47, %v1777_v11  ;;  %1971 = vst.msk [vmem:[%s3013_s22 + $0x38] sm:$0xf] %vm1956_vm3, %v2275_v37  ;;  %v2276_v28 = vpack.c.bf16 %v1811_v23, %v1811_v23  ;;  %v3257_v2 = vmax.f32 %v2926_v57, %v2930_v53  ;;  %v3258_v52 = vld [vmem:[#allocation2_spill] sm:$0xff] }
 0x150   : > { %v1750_v17 = vadd.f32 %v2991_v45, %v1711_v14  ;;  %v1712_v55 = vmax.f32 %v3253_v54, %v1680_v16  ;;  %v1748_v33 = vadd.f32 %v2991_v45, %v1709_v5  ;;  %v1710_v56 = vmax.f32 %v3254_v39, %v1678_v26  ;;  %v3261_v54 = vld [vmem:[#allocation4_spill] sm:$0xff] }
 0x151   : > { %1969 = vst.msk [vmem:[%s3013_s22 + $0x30] sm:$0xf] %vm1956_vm3, %v2273_v38  ;;  %v2274_v1 = vpack.c.bf16 %v1809_v40, %v1809_v40  ;;  %1972 = vst.msk [vmem:[%s3013_s22 + $0x3c] sm:$0xf] %vm1956_vm3, %v2276_v28  ;;  %v3259_v11 = vmax.f32 %v2932_v51, %v3258_v52 }
 0x152   : > { %v1782_v58 = vmul.f32 0.01, %v1750_v17  ;;  %v1751_v6 = vadd.f32 %v2991_v45, %v1712_v55  ;;  %v2463_v7 = vpop.f32.mrb[52].mxu0  ;;  %v1780_v15 = vmul.f32 0.01, %v1748_v33  ;;  %v1749_v59 = vadd.f32 %v2991_v45, %v1710_v56  ;;  %v2499_v61 = vpop.f32.mrb[52].mxu1 }
 0x153   : > { %1970 = vst.msk [vmem:[%s3013_s22 + $0x34] sm:$0xf] %vm1956_vm3, %v2274_v1  ;;  %v1261_v36 = vpop.f32.mrb[53].mxu0  ;;  %v1683_v12 = vmax.f32 %v2463_v7, %v2499_v61  ;;  %v1582_v24 = vpop.f32.mrb[53].mxu1  ;;  %v3264_v7 = vld [vmem:[#allocation6_spill] sm:$0xff] }
 0x154   : > { %v1814_v63 = vmax.f32 %v1750_v17, %v1782_v58  ;;  %v1783_v8 = vmul.f32 0.01, %v1751_v6  ;;  %v2464_v62 = vpop.f32.mrb[54].mxu0  ;;  %v1812_v0 = vmax.f32 %v1748_v33, %v1780_v15  ;;  %v1781_v21 = vmul.f32 0.01, %v1749_v59  ;;  %v2500_v43 = vpop.f32.mrb[54].mxu1 }
 0x155   : > { %v1681_v42 = vmax.f32 %v1261_v36, %v1582_v24  ;;  %v1264_v18 = vpop.f32.mrb[55].mxu0  ;;  %v1715_v46 = vmax.f32 %v3255_v44, %v1683_v12  ;;  %v1684_v29 = vmax.f32 %v2464_v62, %v2500_v43  ;;  %v1585_v30 = vpop.f32.mrb[55].mxu1  ;;  %v3260_v17 = vld [vmem:[#allocation3_spill] sm:$0xff]  ;;  %v3267_v12 = vld [vmem:[#allocation8_spill] sm:$0xff]  ;;  %v3270_v43 = vld [vmem:[#allocation10_spill] sm:$0xff] }
 0x156   : > { %v2279_v19 = vpack.c.bf16 %v1814_v63, %v1814_v63  ;;  %v1815_v27 = vmax.f32 %v1751_v6, %v1783_v8  ;;  %v2277_v31 = vpack.c.bf16 %v1812_v0, %v1812_v0  ;;  %v1813_v47 = vmax.f32 %v1749_v59, %v1781_v21  ;;  %v3263_v6 = vld [vmem:[#allocation5_spill] sm:$0xff]  ;;  %v3266_v8 = vld [vmem:[#allocation7_spill] sm:$0xff] }
 0x157   : > { %v1713_v10 = vmax.f32 %v3256_v49, %v1681_v42  ;;  %v1682_v20 = vmax.f32 %v1264_v18, %v1585_v30  ;;  %v1754_v32 = vadd.f32 %v2991_v45, %v1715_v46  ;;  %v1716_v3 = vmax.f32 %v3257_v2, %v1684_v29  ;;  %v3269_v42 = vld [vmem:[#allocation9_spill] sm:$0xff] }
 0x158   : > { %1975 = vst.msk [vmem:[%s3013_s22 + $0x48] sm:$0xf] %vm1956_vm3, %v2279_v19  ;;  %v2280_v22 = vpack.c.bf16 %v1815_v27, %v1815_v27  ;;  %1973 = vst.msk [vmem:[%s3013_s22 + $0x40] sm:$0xf] %vm1956_vm3, %v2277_v31  ;;  %v2278_v34 = vpack.c.bf16 %v1813_v47, %v1813_v47  ;;  %v3262_v55 = vmax.f32 %v3260_v17, %v3261_v54 }
 0x159   : > { %v1752_v50 = vadd.f32 %v2991_v45, %v1713_v10  ;;  %v1714_v60 = vmax.f32 %v3259_v11, %v1682_v20  ;;  %v1786_v4 = vmul.f32 0.01, %v1754_v32  ;;  %v1755_v13 = vadd.f32 %v2991_v45, %v1716_v3 }
 0x15a   : > { %1976 = vst.msk [vmem:[%s3013_s22 + $0x4c] sm:$0xf] %vm1956_vm3, %v2280_v22  ;;  %v2467_v9 = vpop.f32.mrb[56].mxu0  ;;  %1974 = vst.msk [vmem:[%s3013_s22 + $0x44] sm:$0xf] %vm1956_vm3, %v2278_v34  ;;  %v2503_v57 = vpop.f32.mrb[56].mxu1  ;;  %v3265_v15 = vmax.f32 %v3263_v6, %v3264_v7  ;;  %v3268_v24 = vmax.f32 %v3266_v8, %v3267_v12  ;;  %v3271_v18 = vmax.f32 %v3269_v42, %v3270_v43 }
 0x15b   : > { %v1784_v35 = vmul.f32 0.01, %v1752_v50  ;;  %v1753_v53 = vadd.f32 %v2991_v45, %v1714_v60  ;;  %v1277_v37 = vpop.f32.mrb[57].mxu0  ;;  %v1818_v23 = vmax.f32 %v1754_v32, %v1786_v4  ;;  %v1787_v25 = vmul.f32 0.01, %v1755_v13  ;;  %v1598_v16 = vpop.f32.mrb[57].mxu1 }
 0x15c   : > { %v1687_v14 = vmax.f32 %v2467_v9, %v2503_v57  ;;  %v2468_v51 = vpop.f32.mrb[58].mxu0  ;;  %v1685_v40 = vmax.f32 %v1277_v37, %v1598_v16  ;;  %v2504_v48 = vpop.f32.mrb[58].mxu1  ;;  %v3272_v4 = vld [vmem:[#allocation11_spill] sm:$0xff] }
 0x15d   : > { %v1816_v41 = vmax.f32 %v1752_v50, %v1784_v35  ;;  %v1785_v38 = vmul.f32 0.01, %v1753_v53  ;;  %v1280_v5 = vpop.f32.mrb[59].mxu0  ;;  %v2283_v26 = vpack.c.bf16 %v1818_v23, %v1818_v23  ;;  %v1819_v28 = vmax.f32 %v1755_v13, %v1787_v25  ;;  %v1601_v39 = vpop.f32.mrb[59].mxu1  ;;  %v3273_v13 = vld [vmem:[#allocation12_spill] sm:$0xff]  ;;  %v3275_v25 = vld [vmem:[#allocation13_spill] sm:$0xff] }
 0x15e   : > { %v1719_v1 = vmax.f32 %v3262_v55, %v1687_v14  ;;  %v1688_v33 = vmax.f32 %v2468_v51, %v2504_v48  ;;  %v1717_v59 = vmax.f32 %v3265_v15, %v1685_v40  ;;  %v1686_v61 = vmax.f32 %v1280_v5, %v1601_v39  ;;  %v3276_v14 = vld [vmem:[#allocation14_spill] sm:$0xff]  ;;  %v3278_v48 = vld [vmem:[#allocation15_spill] sm:$0xff]  ;;  %v3279_v5 = vld [vmem:[#allocation16_spill] sm:$0xff] }
 0x15f   : > { %v2281_v56 = vpack.c.bf16 %v1816_v41, %v1816_v41  ;;  %v1817_v58 = vmax.f32 %v1753_v53, %v1785_v38  ;;  %1979 = vst.msk [vmem:[%s3013_s22 + $0x58] sm:$0xf] %vm1956_vm3, %v2283_v26  ;;  %v2284_v36 = vpack.c.bf16 %v1819_v28, %v1819_v28  ;;  %v3274_v9 = vmax.f32 %v3272_v4, %v3273_v13  ;;  %v3281_v55 = vld [vmem:[#allocation17_spill] sm:$0xff] }
 0x160   : > { %v1758_v63 = vadd.f32 %v2991_v45, %v1719_v1  ;;  %v1720_v62 = vmax.f32 %v3268_v24, %v1688_v33  ;;  %v1756_v21 = vadd.f32 %v2991_v45, %v1717_v59  ;;  %v1718_v19 = vmax.f32 %v3271_v18, %v1686_v61  ;;  %v3282_v1 = vld [vmem:[#allocation18_spill] sm:$0xff] }
 0x161   : > { %1977 = vst.msk [vmem:[%s3013_s22 + $0x50] sm:$0xf] %vm1956_vm3, %v2281_v56  ;;  %v2282_v0 = vpack.c.bf16 %v1817_v58, %v1817_v58  ;;  %1980 = vst.msk [vmem:[%s3013_s22 + $0x5c] sm:$0xf] %vm1956_vm3, %v2284_v36  ;;  %v3277_v16 = vmax.f32 %v3275_v25, %v3276_v14  ;;  %v3280_v26 = vmax.f32 %v3278_v48, %v3279_v5 }
 0x162   : > { %v1790_v27 = vmul.f32 0.01, %v1758_v63  ;;  %v1759_v44 = vadd.f32 %v2991_v45, %v1720_v62  ;;  %v2471_v46 = vpop.f32.mrb[60].mxu0  ;;  %v1788_v29 = vmul.f32 0.01, %v1756_v21  ;;  %v1757_v30 = vadd.f32 %v2991_v45, %v1718_v19  ;;  %v2507_v31 = vpop.f32.mrb[60].mxu1 }
 0x163   : > { %1978 = vst.msk [vmem:[%s3013_s22 + $0x54] sm:$0xf] %vm1956_vm3, %v2282_v0  ;;  %v1293_v47 = vpop.f32.mrb[61].mxu0  ;;  %v1691_v20 = vmax.f32 %v2471_v46, %v2507_v31  ;;  %v1614_v22 = vpop.f32.mrb[61].mxu1  ;;  %v3283_v33 = vmax.f32 %v3281_v55, %v3282_v1 }
 0x164   : > { %v1822_v49 = vmax.f32 %v1758_v63, %v1790_v27  ;;  %v1791_v10 = vmul.f32 0.01, %v1759_v44  ;;  %v2472_v32 = vpop.f32.mrb[62].mxu0  ;;  %v1820_v2 = vmax.f32 %v1756_v21, %v1788_v29  ;;  %v1789_v3 = vmul.f32 0.01, %v1757_v30  ;;  %v2508_v50 = vpop.f32.mrb[62].mxu1 }
 0x165   : > { %v1689_v34 = vmax.f32 %v1293_v47, %v1614_v22  ;;  %v1296_v52 = vpop.f32.mrb[63].mxu0  ;;  %v1723_v35 = vmax.f32 %v3274_v9, %v1691_v20  ;;  %v1692_v53 = vmax.f32 %v2472_v32, %v2508_v50  ;;  %v1617_v57 = vpop.f32.mrb[63].mxu1 }
 0x166   : > { %v2287_v11 = vpack.c.bf16 %v1822_v49, %v1822_v49  ;;  %v1823_v60 = vmax.f32 %v1759_v44, %v1791_v10  ;;  %v2285_v37 = vpack.c.bf16 %v1820_v2, %v1820_v2  ;;  %v1821_v23 = vmax.f32 %v1757_v30, %v1789_v3 }
 0x167   : > { %v1721_v51 = vmax.f32 %v3277_v16, %v1689_v34  ;;  %v1690_v41 = vmax.f32 %v1296_v52, %v1617_v57  ;;  %v1762_v40 = vadd.f32 %v2991_v45, %v1723_v35  ;;  %v1724_v28 = vmax.f32 %v3280_v26, %v1692_v53 }
 0x168   : > { %1983 = vst.msk [vmem:[%s3013_s22 + $0x68] sm:$0xf] %vm1956_vm3, %v2287_v11  ;;  %v2288_v38 = vpack.c.bf16 %v1823_v60, %v1823_v60  ;;  %1981 = vst.msk [vmem:[%s3013_s22 + $0x60] sm:$0xf] %vm1956_vm3, %v2285_v37  ;;  %v2286_v17 = vpack.c.bf16 %v1821_v23, %v1821_v23 }
 0x169   : > { %v1760_v54 = vadd.f32 %v2991_v45, %v1721_v51  ;;  %v1722_v39 = vmax.f32 %v3283_v33, %v1690_v41  ;;  %v1794_v56 = vmul.f32 0.01, %v1762_v40  ;;  %v1763_v58 = vadd.f32 %v2991_v45, %v1724_v28 }
 0x16a   : > { %1984 = vst.msk [vmem:[%s3013_s22 + $0x6c] sm:$0xf] %vm1956_vm3, %v2288_v38  ;;  %1982 = vst.msk [vmem:[%s3013_s22 + $0x64] sm:$0xf] %vm1956_vm3, %v2286_v17 }
 0x16b   : > { %v1792_v6 = vmul.f32 0.01, %v1760_v54  ;;  %v1761_v7 = vadd.f32 %v2991_v45, %v1722_v39  ;;  %v1826_v15 = vmax.f32 %v1762_v40, %v1794_v56  ;;  %v1795_v59 = vmul.f32 0.01, %v1763_v58 }
 0x16d   : > { %v1824_v61 = vmax.f32 %v1760_v54, %v1792_v6  ;;  %v1793_v36 = vmul.f32 0.01, %v1761_v7  ;;  %v2291_v63 = vpack.c.bf16 %v1826_v15, %v1826_v15  ;;  %v1827_v8 = vmax.f32 %v1763_v58, %v1795_v59 }
 0x16f   : > { %v2289_v12 = vpack.c.bf16 %v1824_v61, %v1824_v61  ;;  %v1825_v24 = vmax.f32 %v1761_v7, %v1793_v36  ;;  %1987 = vst.msk [vmem:[%s3013_s22 + $0x78] sm:$0xf] %vm1956_vm3, %v2291_v63  ;;  %v2292_v62 = vpack.c.bf16 %v1827_v8, %v1827_v8 }
 0x171   : > { %1985 = vst.msk [vmem:[%s3013_s22 + $0x70] sm:$0xf] %vm1956_vm3, %v2289_v12  ;;  %v2290_v0 = vpack.c.bf16 %v1825_v24, %v1825_v24  ;;  %1988 = vst.msk [vmem:[%s3013_s22 + $0x7c] sm:$0xf] %vm1956_vm3, %v2292_v62 }
 0x173   : > { %1986 = vst.msk [vmem:[%s3013_s22 + $0x74] sm:$0xf] %vm1956_vm3, %v2290_v0 }
 0x174 PF: > { %s16_s21 = sadd.s32 1, %s2590_s21  }
 0x175   : > { %p13_p4 = scmp.ge.s32.totalorder %s16_s21, 4  }
 0x177   :  { %15 = sbr.rel (!%p13_p4) target bundleno = 1 (0x1), region = 83 }

// kernel: cnn_fmnist_forward.4
= control target key start
LH: loop header
LB: loop body
LE: loop exit
PB: predicated region body
PF: predicated region fallthrough
CT: control target
= control target key end

     0   :  { %v1665_v0 = vmov 0   ;;  %vm316_vm0 = vcmask 130048   ;;  %vm1248_vm1 = vcmask 257024   ;;  %s2311_s4 = inlined_call_operand.vmem [shape: bf16[400,32], index: 4, kind: input, shape index: {}]   ;;  %s2312_s0 = inlined_call_operand.vmem [shape: bf16[64,400], index: 0, kind: input, shape index: {}]   ;;  %s2313_s1 = inlined_call_operand.vmem [shape: bf16[64,400], index: 1, kind: input, shape index: {}]   ;;  %s2314_s2 = inlined_call_operand.vmem [shape: bf16[64,400], index: 2, kind: input, shape index: {}]   ;;  %s2315_s3 = inlined_call_operand.vmem [shape: bf16[64,400], index: 3, kind: input, shape index: {}]   ;;  %s2316_s5 = inlined_call_operand.vmem [shape: f32[1,32], index: 5, kind: input, shape index: {}]   ;;  %s2317_s6 = inlined_call_operand.vmem [shape: bf16[64,32], index: 6, kind: output, shape index: {}]  }
   0x1   :  { %394 = vmatprep.subr.bf16.mxu1 %v1665_v0  ;;  %v1705_v1 = vld [vmem:[%s2311_s4 + $0x40] sm:$0xff]   ;;  %v1722_v4 = vld [vmem:[%s2311_s4 + $0x48] sm:$0xff]   ;;  %v1740_v7 = vld [vmem:[%s2311_s4 + $0x50] sm:$0xff]  }
   0x2   :  { %v1710_v2 = vld [vmem:[%s2311_s4 + $0x80] sm:$0xff]   ;;  %1383 = vmatprep.subr.bf16.mxu0 %v1705_v1  ;;  %v1729_v5 = vld [vmem:[%s2311_s4 + $0x88] sm:$0xff]   ;;  %v1746_v8 = vld [vmem:[%s2311_s4 + $0x90] sm:$0xff]  }
   0x3   :  { %v1716_v3 = vld [vmem:[%s2311_s4] sm:$0xff]   ;;  %395 = vmatpush1.bf16.msra.mxu1 %v1710_v2  ;;  %v1735_v6 = vld [vmem:[%s2311_s4 + $0x8] sm:$0xff]   ;;  %v1753_v9 = vld [vmem:[%s2311_s4 + $0x10] sm:$0xff]  }
   0x4   :  { %1384 = vmatpush3.bf16.msra.mxu0 %v1716_v3  ;;  %396 = vmatprep.subr.bf16.mxu1 %v1665_v0  ;;  %v1759_v10 = vld [vmem:[%s2311_s4 + $0x58] sm:$0xff]   ;;  %v1778_v13 = vld [vmem:[%s2311_s4 + $0x60] sm:$0xff]   ;;  %v1797_v16 = vld [vmem:[%s2311_s4 + $0x68] sm:$0xff]  }
   0x5   :  { %1385 = vmatprep.subr.bf16.mxu0 %v1722_v4  ;;  %v1765_v11 = vld [vmem:[%s2311_s4 + $0x98] sm:$0xff]   ;;  %v1784_v14 = vld [vmem:[%s2311_s4 + $0xa0] sm:$0xff]   ;;  %v1803_v17 = vld [vmem:[%s2311_s4 + $0xa8] sm:$0xff]  }
   0x6   :  { %v1772_v12 = vld [vmem:[%s2311_s4 + $0x18] sm:$0xff]   ;;  %v1791_v15 = vld [vmem:[%s2311_s4 + $0x20] sm:$0xff]   ;;  %v1810_v18 = vld [vmem:[%s2311_s4 + $0x28] sm:$0xff]  }
   0x7   :  { %397 = vmatpush1.bf16.msra.mxu1 %v1729_v5  ;;  %v1816_v19 = vld [vmem:[%s2311_s4 + $0x70] sm:$0xff]   ;;  %v1834_v22 = vld [vmem:[%s2311_s4 + $0x78] sm:$0xff]   ;;  %v1865_v28 = vld [vmem:[%s2311_s4 + $0xc0] sm:$0xff]  }
   0x8   :  { %1386 = vmatpush3.bf16.msra.mxu0 %v1735_v6  ;;  %398 = vmatprep.subr.bf16.mxu1 %v1665_v0  ;;  %v1821_v20 = vld [vmem:[%s2311_s4 + $0xb0] sm:$0xff]   ;;  %v1844_v24 = vld [vmem:[%s2311_s4 + $0xb8] sm:$0xff]  }
   0x9   :  { %1387 = vmatprep.subr.bf16.mxu0 %v1740_v7  ;;  %v1827_v21 = vld [vmem:[%s2311_s4 + $0x30] sm:$0xff]   ;;  %v1574_v25 = vld [vmem:[%s2312_s0 + $0xc] ss:$16 sps:$4 sm:$0xff]   ;;  %v1572_v30 = vld [vmem:[%s2312_s0 + $0x8] ss:$16 sps:$4 sm:$0xff]  }
   0xa   :  { %v1570_v23 = vld [vmem:[%s2312_s0 + $0x4] ss:$16 sps:$4 sm:$0xff]   ;;  %v1854_v26 = vld [vmem:[%s2311_s4 + $0x38] sm:$0xff]   ;;  %1302 = vmatprep.mubr.msk.bf16.mxu1 %vm316_vm0, %v1574_v25  ;;  %v1568_v27 = vld [vmem:[%s2312_s0] ss:$16 sps:$4 sm:$0xff]  }
   0xb   :  { %399 = vmatpush1.bf16.msra.mxu1 %v1746_v8  ;;  %361 = vmatprep.mubr.bf16.mxu0 %v1570_v23  ;;  %v1575_v29 = vld [vmem:[%s2312_s0 + $0x24] ss:$16 sps:$4 sm:$0xff]   ;;  %v1578_v31 = vld [vmem:[%s2312_s0 + $0x2c] ss:$16 sps:$4 sm:$0xff]   ;;  %v1577_v32 = vld [vmem:[%s2312_s0 + $0x20] ss:$16 sps:$4 sm:$0xff]  }
   0xc   :  { %1388 = vmatpush3.bf16.msra.mxu0 %v1753_v9  ;;  %400 = vmatprep.subr.bf16.mxu1 %v1665_v0  ;;  %v1581_v33 = vld [vmem:[%s2312_s0 + $0x44] ss:$16 sps:$4 sm:$0xff]   ;;  %v1580_v34 = vld [vmem:[%s2312_s0 + $0x28] ss:$16 sps:$4 sm:$0xff]   ;;  %v1584_v35 = vld [vmem:[%s2312_s0 + $0x4c] ss:$16 sps:$4 sm:$0xff]  }
   0xd   :  { %1389 = vmatprep.subr.bf16.mxu0 %v1759_v10  ;;  %v1583_v36 = vld [vmem:[%s2312_s0 + $0x40] ss:$16 sps:$4 sm:$0xff]   ;;  %v1587_v37 = vld [vmem:[%s2312_s0 + $0x64] ss:$16 sps:$4 sm:$0xff]   ;;  %v1586_v38 = vld [vmem:[%s2312_s0 + $0x48] ss:$16 sps:$4 sm:$0xff]  }
   0xe   :  { %v1590_v39 = vld [vmem:[%s2312_s0 + $0x6c] ss:$16 sps:$4 sm:$0xff]   ;;  %v1589_v40 = vld [vmem:[%s2312_s0 + $0x60] ss:$16 sps:$4 sm:$0xff]   ;;  %v1595_v41 = vld [vmem:[%s2313_s1 + $0x4] ss:$16 sps:$4 sm:$0xff]  }
   0xf   :  { %401 = vmatpush1.bf16.msra.mxu1 %v1765_v11  ;;  %v1592_v42 = vld [vmem:[%s2312_s0 + $0x68] ss:$16 sps:$4 sm:$0xff]   ;;  %v1598_v43 = vld [vmem:[%s2313_s1 + $0xc] ss:$16 sps:$4 sm:$0xff]   ;;  %v1593_v44 = vld [vmem:[%s2313_s1] ss:$16 sps:$4 sm:$0xff]  }
  0x10   :  { %1390 = vmatpush3.bf16.msra.mxu0 %v1772_v12  ;;  %402 = vmatprep.subr.bf16.mxu1 %v1665_v0  ;;  %v1599_v45 = vld [vmem:[%s2313_s1 + $0x24] ss:$16 sps:$4 sm:$0xff]   ;;  %v1596_v46 = vld [vmem:[%s2313_s1 + $0x8] ss:$16 sps:$4 sm:$0xff]   ;;  %v1601_v47 = vld [vmem:[%s2313_s1 + $0x20] ss:$16 sps:$4 sm:$0xff]  }
  0x11   :  { %1391 = vmatprep.subr.bf16.mxu0 %v1778_v13  ;;  %v1602_v48 = vld [vmem:[%s2313_s1 + $0x2c] ss:$16 sps:$4 sm:$0xff]   ;;  %v1605_v49 = vld [vmem:[%s2313_s1 + $0x44] ss:$16 sps:$4 sm:$0xff]   ;;  %v1604_v50 = vld [vmem:[%s2313_s1 + $0x28] ss:$16 sps:$4 sm:$0xff]  }
  0x12   :  { %v1607_v51 = vld [vmem:[%s2313_s1 + $0x40] ss:$16 sps:$4 sm:$0xff]   ;;  %v1608_v52 = vld [vmem:[%s2313_s1 + $0x4c] ss:$16 sps:$4 sm:$0xff]   ;;  %v1611_v53 = vld [vmem:[%s2313_s1 + $0x64] ss:$16 sps:$4 sm:$0xff]  }
  0x13   :  { %403 = vmatpush1.bf16.msra.mxu1 %v1784_v14  ;;  %v1610_v54 = vld [vmem:[%s2313_s1 + $0x48] ss:$16 sps:$4 sm:$0xff]   ;;  %v1613_v55 = vld [vmem:[%s2313_s1 + $0x60] ss:$16 sps:$4 sm:$0xff]   ;;  %v1614_v56 = vld [vmem:[%s2313_s1 + $0x6c] ss:$16 sps:$4 sm:$0xff]  }
  0x14   :  { %1392 = vmatpush3.bf16.msra.mxu0 %v1791_v15  ;;  %404 = vmatprep.subr.bf16.mxu1 %v1665_v0  ;;  %v1619_v57 = vld [vmem:[%s2314_s2 + $0x4] ss:$16 sps:$4 sm:$0xff]   ;;  %v1616_v58 = vld [vmem:[%s2313_s1 + $0x68] ss:$16 sps:$4 sm:$0xff]   ;;  %v1622_v59 = vld [vmem:[%s2314_s2 + $0xc] ss:$16 sps:$4 sm:$0xff]  }
  0x15   :  { %1393 = vmatprep.subr.bf16.mxu0 %v1797_v16  ;;  %v1617_v60 = vld [vmem:[%s2314_s2] ss:$16 sps:$4 sm:$0xff]   ;;  %v1623_v61 = vld [vmem:[%s2314_s2 + $0x24] ss:$16 sps:$4 sm:$0xff]   ;;  %v1658_v23 = vld [vmem:[%s2315_s3 + $0x48] ss:$16 sps:$4 sm:$0xff]  }
  0x16   :  { %v1625_v62 = vld [vmem:[%s2314_s2 + $0x20] ss:$16 sps:$4 sm:$0xff]   ;;  %v1629_v63 = vld [vmem:[%s2314_s2 + $0x44] ss:$16 sps:$4 sm:$0xff]   ;;  %v1664_v25 = vld [vmem:[%s2315_s3 + $0x68] ss:$16 sps:$4 sm:$0xff]  }
  0x17   :  { %405 = vmatpush1.bf16.msra.mxu1 %v1803_v17 }
  0x18   :  { %1394 = vmatpush3.bf16.msra.mxu0 %v1810_v18  ;;  %406 = vmatprep.subr.bf16.mxu1 %v1665_v0 }
  0x19   :  { %1395 = vmatprep.subr.bf16.mxu0 %v1816_v19 }
  0x1b   :  { %407 = vmatpush1.bf16.msra.mxu1 %v1821_v20 }
  0x1c   :  { %1396 = vmatpush3.bf16.msra.mxu0 %v1827_v21  ;;  %408 = vmatprep.subr.bf16.mxu1 %v1665_v0 }
  0x1d   :  { %1397 = vmatprep.subr.bf16.mxu0 %v1834_v22 }
  0x1f   :  { %409 = vmatpush1.bf16.msra.mxu1 %v1844_v24 }
  0x20   :  { %1398 = vmatpush3.bf16.msra.mxu0 %v1854_v26  ;;  %410 = vmatprep.subr.bf16.mxu1 %v1665_v0 }
  0x21   :  { %1423 = vmatprep.subr.bf16.mxu0 %v1705_v1 }
  0x23   :  { %362 = vmatmul.mubr.bf16.vlgmr.msra.gmra.mrb[0].mxu0 %v1568_v27  ;;  %411 = vmatpush1.bf16.msra.mxu1 %v1865_v28 }
  0x24   :  { %628 = vmatprep.subr.bf16.mxu1 %v1665_v0  ;;  %1424 = vmatpush3.bf16.msra.mxu0 %v1716_v3 }
  0x25   :  { %1425 = vmatprep.subr.bf16.mxu0 %v1722_v4  ;;  %369 = vmatprep.mubr.bf16.mxu0 %v1575_v29 }
  0x26   :  { %427 = vmatmul.mubr.bf16.vlgmr.msra.gmra.mrb[0].mxu1 %v1572_v30 }
  0x27   :  { %629 = vmatpush1.bf16.msra.mxu1 %v1710_v2  ;;  %1303 = vmatprep.mubr.msk.bf16.mxu1 %vm316_vm0, %v1578_v31 }
  0x28   :  { %630 = vmatprep.subr.bf16.mxu1 %v1665_v0  ;;  %1426 = vmatpush3.bf16.msra.mxu0 %v1735_v6 }
  0x29   :  { %1427 = vmatprep.subr.bf16.mxu0 %v1740_v7 }
  0x2b   :  { %631 = vmatpush1.bf16.msra.mxu1 %v1729_v5  ;;  %370 = vmatmul.mubr.bf16.gmra.mrb[4].mxu0 %v1577_v32 }
  0x2c   :  { %632 = vmatprep.subr.bf16.mxu1 %v1665_v0  ;;  %1428 = vmatpush3.bf16.msra.mxu0 %v1753_v9 }
  0x2d   :  { %1429 = vmatprep.subr.bf16.mxu0 %v1759_v10  ;;  %377 = vmatprep.mubr.bf16.mxu0 %v1581_v33 }
  0x2e   :  { %435 = vmatmul.mubr.bf16.gmra.mrb[4].mxu1 %v1580_v34 }
  0x2f   :  { %633 = vmatpush1.bf16.msra.mxu1 %v1746_v8  ;;  %1304 = vmatprep.mubr.msk.bf16.mxu1 %vm316_vm0, %v1584_v35 }
  0x30   :  { %634 = vmatprep.subr.bf16.mxu1 %v1665_v0  ;;  %1430 = vmatpush3.bf16.msra.mxu0 %v1772_v12 }
  0x31   :  { %1431 = vmatprep.subr.bf16.mxu0 %v1778_v13 }
  0x33   :  { %635 = vmatpush1.bf16.msra.mxu1 %v1765_v11  ;;  %378 = vmatmul.mubr.bf16.gmra.mrb[8].mxu0 %v1583_v36 }
  0x34   :  { %636 = vmatprep.subr.bf16.mxu1 %v1665_v0  ;;  %1432 = vmatpush3.bf16.msra.mxu0 %v1791_v15 }
  0x35   :  { %1433 = vmatprep.subr.bf16.mxu0 %v1797_v16  ;;  %385 = vmatprep.mubr.bf16.mxu0 %v1587_v37 }
  0x36   :  { %443 = vmatmul.mubr.bf16.gmra.mrb[8].mxu1 %v1586_v38 }
  0x37   :  { %637 = vmatpush1.bf16.msra.mxu1 %v1784_v14  ;;  %1305 = vmatprep.mubr.msk.bf16.mxu1 %vm316_vm0, %v1590_v39 }
  0x38   :  { %638 = vmatprep.subr.bf16.mxu1 %v1665_v0  ;;  %1434 = vmatpush3.bf16.msra.mxu0 %v1810_v18 }
  0x39   :  { %1435 = vmatprep.subr.bf16.mxu0 %v1816_v19 }
  0x3b   :  { %639 = vmatpush1.bf16.msra.mxu1 %v1803_v17  ;;  %386 = vmatmul.mubr.bf16.gmra.mrb[12].mxu0 %v1589_v40 }
  0x3c   :  { %640 = vmatprep.subr.bf16.mxu1 %v1665_v0  ;;  %1436 = vmatpush3.bf16.msra.mxu0 %v1827_v21 }
  0x3d   :  { %1437 = vmatprep.subr.bf16.mxu0 %v1834_v22  ;;  %595 = vmatprep.mubr.bf16.mxu0 %v1595_v41 }
  0x3e   :  { %451 = vmatmul.mubr.bf16.gmra.mrb[12].mxu1 %v1592_v42 }
  0x3f   :  { %641 = vmatpush1.bf16.msra.mxu1 %v1821_v20  ;;  %1322 = vmatprep.mubr.msk.bf16.mxu1 %vm316_vm0, %v1598_v43 }
  0x40   :  { %642 = vmatprep.subr.bf16.mxu1 %v1665_v0  ;;  %1438 = vmatpush3.bf16.msra.mxu0 %v1854_v26 }
  0x41   :  { %1463 = vmatprep.subr.bf16.mxu0 %v1705_v1 }
  0x43   :  { %643 = vmatpush1.bf16.msra.mxu1 %v1844_v24  ;;  %596 = vmatmul.mubr.bf16.vlgmr.msra.gmra.mrb[16].mxu0 %v1593_v44 }
  0x44   :  { %644 = vmatprep.subr.bf16.mxu1 %v1665_v0  ;;  %1464 = vmatpush3.bf16.msra.mxu0 %v1716_v3 }
  0x45   :  { %603 = vmatprep.mubr.bf16.mxu0 %v1599_v45  ;;  %1465 = vmatprep.subr.bf16.mxu0 %v1722_v4 }
  0x47   :  { %645 = vmatpush1.bf16.msra.mxu1 %v1865_v28 }
  0x48   :  { %862 = vmatprep.subr.bf16.mxu1 %v1665_v0  ;;  %1466 = vmatpush3.bf16.msra.mxu0 %v1735_v6 }
  0x49   :  { %1467 = vmatprep.subr.bf16.mxu0 %v1740_v7 }
  0x4a   :  { %661 = vmatmul.mubr.bf16.vlgmr.msra.gmra.mrb[16].mxu1 %v1596_v46 }
  0x4b   :  { %863 = vmatpush1.bf16.msra.mxu1 %v1710_v2  ;;  %604 = vmatmul.mubr.bf16.gmra.mrb[20].mxu0 %v1601_v47 }
  0x4c   :  { %864 = vmatprep.subr.bf16.mxu1 %v1665_v0  ;;  %1323 = vmatprep.mubr.msk.bf16.mxu1 %vm316_vm0, %v1602_v48 }
  0x4d   :  { %1468 = vmatpush3.bf16.msra.mxu0 %v1753_v9  ;;  %611 = vmatprep.mubr.bf16.mxu0 %v1605_v49 }
  0x4e   :  { %1469 = vmatprep.subr.bf16.mxu0 %v1759_v10 }
  0x4f   :  { %865 = vmatpush1.bf16.msra.mxu1 %v1729_v5 }
  0x50   :  { %866 = vmatprep.subr.bf16.mxu1 %v1665_v0 }
  0x51   :  { %1470 = vmatpush3.bf16.msra.mxu0 %v1772_v12 }
  0x52   :  { %669 = vmatmul.mubr.bf16.gmra.mrb[20].mxu1 %v1604_v50  ;;  %1471 = vmatprep.subr.bf16.mxu0 %v1778_v13 }
  0x53   :  { %867 = vmatpush1.bf16.msra.mxu1 %v1746_v8  ;;  %612 = vmatmul.mubr.bf16.gmra.mrb[24].mxu0 %v1607_v51 }
  0x54   :  { %868 = vmatprep.subr.bf16.mxu1 %v1665_v0  ;;  %1324 = vmatprep.mubr.msk.bf16.mxu1 %vm316_vm0, %v1608_v52 }
  0x55   :  { %1472 = vmatpush3.bf16.msra.mxu0 %v1791_v15  ;;  %619 = vmatprep.mubr.bf16.mxu0 %v1611_v53 }
  0x56   :  { %1473 = vmatprep.subr.bf16.mxu0 %v1797_v16 }
  0x57   :  { %869 = vmatpush1.bf16.msra.mxu1 %v1765_v11 }
  0x58   :  { %870 = vmatprep.subr.bf16.mxu1 %v1665_v0 }
  0x59   :  { %1474 = vmatpush3.bf16.msra.mxu0 %v1810_v18 }
  0x5a   :  { %677 = vmatmul.mubr.bf16.gmra.mrb[24].mxu1 %v1610_v54  ;;  %1475 = vmatprep.subr.bf16.mxu0 %v1816_v19 }
  0x5b   :  { %871 = vmatpush1.bf16.msra.mxu1 %v1784_v14  ;;  %620 = vmatmul.mubr.bf16.gmra.mrb[28].mxu0 %v1613_v55 }
  0x5c   :  { %872 = vmatprep.subr.bf16.mxu1 %v1665_v0  ;;  %1325 = vmatprep.mubr.msk.bf16.mxu1 %vm316_vm0, %v1614_v56 }
  0x5d   :  { %1476 = vmatpush3.bf16.msra.mxu0 %v1827_v21  ;;  %829 = vmatprep.mubr.bf16.mxu0 %v1619_v57 }
  0x5e   :  { %1477 = vmatprep.subr.bf16.mxu0 %v1834_v22 }
  0x5f   :  { %873 = vmatpush1.bf16.msra.mxu1 %v1803_v17 }
  0x60   :  { %874 = vmatprep.subr.bf16.mxu1 %v1665_v0 }
  0x61   :  { %1478 = vmatpush3.bf16.msra.mxu0 %v1854_v26 }
  0x62   :  { %685 = vmatmul.mubr.bf16.gmra.mrb[28].mxu1 %v1616_v58  ;;  %1503 = vmatprep.subr.bf16.mxu0 %v1705_v1  ;;  %v1620_v1 = vld [vmem:[%s2314_s2 + $0x8] ss:$16 sps:$4 sm:$0xff]  }
  0x63   :  { %875 = vmatpush1.bf16.msra.mxu1 %v1821_v20  ;;  %1342 = vmatprep.mubr.msk.bf16.mxu1 %vm316_vm0, %v1622_v59 }
  0x64   :  { %876 = vmatprep.subr.bf16.mxu1 %v1665_v0  ;;  %830 = vmatmul.mubr.bf16.vlgmr.msra.gmra.mrb[32].mxu0 %v1617_v60 }
  0x65   :  { %1504 = vmatpush3.bf16.msra.mxu0 %v1716_v3  ;;  %837 = vmatprep.mubr.bf16.mxu0 %v1623_v61  ;;  %v1626_v3 = vld [vmem:[%s2314_s2 + $0x2c] ss:$16 sps:$4 sm:$0xff]  }
  0x66   :  { %1505 = vmatprep.subr.bf16.mxu0 %v1722_v4  ;;  %v1631_v4 = vld [vmem:[%s2314_s2 + $0x40] ss:$16 sps:$4 sm:$0xff]  }
  0x67   :  { %877 = vmatpush1.bf16.msra.mxu1 %v1844_v24 }
  0x68   :  { %878 = vmatprep.subr.bf16.mxu1 %v1665_v0 }
  0x69   :  { %1506 = vmatpush3.bf16.msra.mxu0 %v1735_v6  ;;  %v1635_v6 = vld [vmem:[%s2314_s2 + $0x64] ss:$16 sps:$4 sm:$0xff]  }
  0x6a   :  { %1507 = vmatprep.subr.bf16.mxu0 %v1740_v7  ;;  %v1628_v7 = vld [vmem:[%s2314_s2 + $0x28] ss:$16 sps:$4 sm:$0xff]  }
  0x6b   :  { %879 = vmatpush1.bf16.msra.mxu1 %v1865_v28 }
  0x6c   :  { %1096 = vmatprep.subr.bf16.mxu1 %v1665_v0  ;;  %838 = vmatmul.mubr.bf16.gmra.mrb[36].mxu0 %v1625_v62 }
  0x6d   :  { %1508 = vmatpush3.bf16.msra.mxu0 %v1753_v9  ;;  %845 = vmatprep.mubr.bf16.mxu0 %v1629_v63  ;;  %v1643_v9 = vld [vmem:[%s2315_s3 + $0x4] ss:$16 sps:$4 sm:$0xff]  }
  0x6e   :  { %895 = vmatmul.mubr.bf16.vlgmr.msra.gmra.mrb[32].mxu1 %v1620_v1  ;;  %1509 = vmatprep.subr.bf16.mxu0 %v1759_v10  ;;  %v1634_v10 = vld [vmem:[%s2314_s2 + $0x48] ss:$16 sps:$4 sm:$0xff]  }
  0x6f   :  { %1097 = vmatpush1.bf16.msra.mxu1 %v1710_v2  ;;  %1343 = vmatprep.mubr.msk.bf16.mxu1 %vm316_vm0, %v1626_v3  ;;  %v1632_v2 = vld [vmem:[%s2314_s2 + $0x4c] ss:$16 sps:$4 sm:$0xff]  }
  0x70   :  { %1098 = vmatprep.subr.bf16.mxu1 %v1665_v0 }
  0x71   :  { %1510 = vmatpush3.bf16.msra.mxu0 %v1772_v12  ;;  %v1647_v12 = vld [vmem:[%s2315_s3 + $0x24] ss:$16 sps:$4 sm:$0xff]  }
  0x72   :  { %1511 = vmatprep.subr.bf16.mxu0 %v1778_v13  ;;  %v1640_v13 = vld [vmem:[%s2314_s2 + $0x68] ss:$16 sps:$4 sm:$0xff]  }
  0x73   :  { %1099 = vmatpush1.bf16.msra.mxu1 %v1729_v5  ;;  %v1637_v5 = vld [vmem:[%s2314_s2 + $0x60] ss:$16 sps:$4 sm:$0xff]  }
  0x74   :  { %1100 = vmatprep.subr.bf16.mxu1 %v1665_v0  ;;  %846 = vmatmul.mubr.bf16.gmra.mrb[40].mxu0 %v1631_v4 }
  0x75   :  { %1512 = vmatpush3.bf16.msra.mxu0 %v1791_v15  ;;  %853 = vmatprep.mubr.bf16.mxu0 %v1635_v6  ;;  %v1649_v15 = vld [vmem:[%s2315_s3 + $0x20] ss:$16 sps:$4 sm:$0xff]  }
  0x76   :  { %903 = vmatmul.mubr.bf16.gmra.mrb[36].mxu1 %v1628_v7  ;;  %1513 = vmatprep.subr.bf16.mxu0 %v1797_v16  ;;  %v1653_v16 = vld [vmem:[%s2315_s3 + $0x44] ss:$16 sps:$4 sm:$0xff]  }
  0x77   :  { %1101 = vmatpush1.bf16.msra.mxu1 %v1746_v8  ;;  %1344 = vmatprep.mubr.msk.bf16.mxu1 %vm316_vm0, %v1632_v2  ;;  %v1638_v8 = vld [vmem:[%s2314_s2 + $0x6c] ss:$16 sps:$4 sm:$0xff]  }
  0x78   :  { %1102 = vmatprep.subr.bf16.mxu1 %v1665_v0 }
  0x79   :  { %1514 = vmatpush3.bf16.msra.mxu0 %v1810_v18  ;;  %v1650_v18 = vld [vmem:[%s2315_s3 + $0x2c] ss:$16 sps:$4 sm:$0xff]  }
  0x7a   :  { %1515 = vmatprep.subr.bf16.mxu0 %v1816_v19  ;;  %v1655_v19 = vld [vmem:[%s2315_s3 + $0x40] ss:$16 sps:$4 sm:$0xff]  }
  0x7b   :  { %1103 = vmatpush1.bf16.msra.mxu1 %v1765_v11  ;;  %v1641_v11 = vld [vmem:[%s2315_s3] ss:$16 sps:$4 sm:$0xff]  }
  0x7c   :  { %1104 = vmatprep.subr.bf16.mxu1 %v1665_v0  ;;  %854 = vmatmul.mubr.bf16.gmra.mrb[44].mxu0 %v1637_v5 }
  0x7d   :  { %1516 = vmatpush3.bf16.msra.mxu0 %v1827_v21  ;;  %1063 = vmatprep.mubr.bf16.mxu0 %v1643_v9  ;;  %v1656_v21 = vld [vmem:[%s2315_s3 + $0x4c] ss:$16 sps:$4 sm:$0xff]  }
  0x7e   :  { %911 = vmatmul.mubr.bf16.gmra.mrb[40].mxu1 %v1634_v10  ;;  %1517 = vmatprep.subr.bf16.mxu0 %v1834_v22  ;;  %v1661_v22 = vld [vmem:[%s2315_s3 + $0x60] ss:$16 sps:$4 sm:$0xff]  }
  0x7f   :  { %1105 = vmatpush1.bf16.msra.mxu1 %v1784_v14  ;;  %1345 = vmatprep.mubr.msk.bf16.mxu1 %vm316_vm0, %v1638_v8  ;;  %v1646_v14 = vld [vmem:[%s2315_s3 + $0xc] ss:$16 sps:$4 sm:$0xff]  }
  0x80   :  { %1106 = vmatprep.subr.bf16.mxu1 %v1665_v0 }
  0x81   :  { %1518 = vmatpush3.bf16.msra.mxu0 %v1854_v26 }
  0x83   :  { %1107 = vmatpush1.bf16.msra.mxu1 %v1803_v17  ;;  %v1644_v17 = vld [vmem:[%s2315_s3 + $0x8] ss:$16 sps:$4 sm:$0xff]  }
  0x84   :  { %1108 = vmatprep.subr.bf16.mxu1 %v1665_v0  ;;  %1064 = vmatmul.mubr.bf16.vlgmr.msra.gmra.mrb[48].mxu0 %v1641_v11 }
  0x85   :  { %1071 = vmatprep.mubr.bf16.mxu0 %v1647_v12 }
  0x86   :  { %919 = vmatmul.mubr.bf16.gmra.mrb[44].mxu1 %v1640_v13 }
  0x87   :  { %1109 = vmatpush1.bf16.msra.mxu1 %v1821_v20  ;;  %1362 = vmatprep.mubr.msk.bf16.mxu1 %vm316_vm0, %v1646_v14  ;;  %v1652_v20 = vld [vmem:[%s2315_s3 + $0x28] ss:$16 sps:$4 sm:$0xff]  }
  0x88   :  { %1110 = vmatprep.subr.bf16.mxu1 %v1665_v0 }
  0x8b   :  { %1111 = vmatpush1.bf16.msra.mxu1 %v1844_v24  ;;  %v1662_v24 = vld [vmem:[%s2315_s3 + $0x6c] ss:$16 sps:$4 sm:$0xff]  }
  0x8c   :  { %1112 = vmatprep.subr.bf16.mxu1 %v1665_v0  ;;  %1072 = vmatmul.mubr.bf16.gmra.mrb[52].mxu0 %v1649_v15  ;;  %v1659_v0 = vld [vmem:[%s2315_s3 + $0x64] ss:$16 sps:$4 sm:$0xff]  }
  0x8d   :  { %1079 = vmatprep.mubr.bf16.mxu0 %v1653_v16 }
  0x8f   :  { %1113 = vmatpush1.bf16.msra.mxu1 %v1865_v28 }
  0x92   :  { %1129 = vmatmul.mubr.bf16.vlgmr.msra.gmra.mrb[48].mxu1 %v1644_v17 }
  0x93   :  { %1363 = vmatprep.mubr.msk.bf16.mxu1 %vm316_vm0, %v1650_v18 }
  0x94   :  { %1080 = vmatmul.mubr.bf16.gmra.mrb[56].mxu0 %v1655_v19 }
  0x95   :  { %1087 = vmatprep.mubr.bf16.mxu0 %v1659_v0 }
  0x9a   :  { %1137 = vmatmul.mubr.bf16.gmra.mrb[52].mxu1 %v1652_v20 }
  0x9b   :  { %1364 = vmatprep.mubr.msk.bf16.mxu1 %vm316_vm0, %v1656_v21 }
  0x9c   :  { %1088 = vmatmul.mubr.bf16.gmra.mrb[60].mxu0 %v1661_v22 }
  0xa2   :  { %1145 = vmatmul.mubr.bf16.gmra.mrb[56].mxu1 %v1658_v23 }
  0xa3   :  { %1365 = vmatprep.mubr.msk.bf16.mxu1 %vm316_vm0, %v1662_v24 }
  0xaa   :  { %1153 = vmatmul.mubr.bf16.gmra.mrb[60].mxu1 %v1664_v25 }
  0xf6   :  { %v1399_v26 = vpop.f32.mrb[0].mxu0 }
  0xf7   :  { %v1400_v27 = vpop.f32.mrb[1].mxu0 }
  0xf8   :  { %v1401_v28 = vadd.f32 %v1400_v27, %v1399_v26  ;;  %v1402_v29 = vpop.f32.mrb[2].mxu0 }
  0xf9   :  { %v1403_v30 = vpop.f32.mrb[3].mxu0  ;;  %v428_v31 = vpop.f32.mrb[0].mxu1 }
  0xfa   :  { %v1404_v32 = vadd.f32 %v1403_v30, %v1402_v29  ;;  %v2170_v33 = vadd.f32 %v1401_v28, %v428_v31  ;;  %v430_v34 = vpop.f32.mrb[1].mxu1 }
  0xfb   :  { %v431_v35 = vpop.f32.mrb[2].mxu1 }
  0xfc   :  { %v2172_v36 = vadd.f32 %v1404_v32, %v431_v35  ;;  %v433_v37 = vpop.f32.mrb[3].mxu1 }
  0xfe   :  { %v1405_v38 = vpop.f32.mrb[4].mxu0 }
  0xff   :  { %v1406_v39 = vpop.f32.mrb[5].mxu0 }
 0x100   :  { %v1407_v40 = vadd.f32 %v1406_v39, %v1405_v38  ;;  %v1408_v41 = vpop.f32.mrb[6].mxu0 }
 0x101   :  { %v436_v42 = vpop.f32.mrb[4].mxu1  ;;  %v1409_v43 = vpop.f32.mrb[7].mxu0 }
 0x102   :  { %v2174_v44 = vadd.f32 %v1407_v40, %v436_v42  ;;  %v1410_v45 = vadd.f32 %v1409_v43, %v1408_v41  ;;  %v438_v46 = vpop.f32.mrb[5].mxu1 }
 0x103   :  { %v439_v47 = vpop.f32.mrb[6].mxu1 }
 0x104   :  { %v2176_v48 = vadd.f32 %v1410_v45, %v439_v47  ;;  %v441_v49 = vpop.f32.mrb[7].mxu1 }
 0x106   :  { %v1411_v50 = vpop.f32.mrb[8].mxu0 }
 0x107   :  { %v1412_v51 = vpop.f32.mrb[9].mxu0 }
 0x108   :  { %v1413_v52 = vadd.f32 %v1412_v51, %v1411_v50  ;;  %v1414_v53 = vpop.f32.mrb[10].mxu0 }
 0x109   :  { %v444_v54 = vpop.f32.mrb[8].mxu1  ;;  %v1415_v55 = vpop.f32.mrb[11].mxu0 }
 0x10a   :  { %v2178_v56 = vadd.f32 %v1413_v52, %v444_v54  ;;  %v1416_v57 = vadd.f32 %v1415_v55, %v1414_v53  ;;  %v446_v58 = vpop.f32.mrb[9].mxu1 }
 0x10b   :  { %v447_v59 = vpop.f32.mrb[10].mxu1 }
 0x10c   :  { %v2180_v60 = vadd.f32 %v1416_v57, %v447_v59  ;;  %v449_v61 = vpop.f32.mrb[11].mxu1 }
 0x10e   :  { %v1417_v62 = vpop.f32.mrb[12].mxu0 }
 0x10f   :  { %v1418_v63 = vpop.f32.mrb[13].mxu0 }
 0x110   :  { %v1419_v1 = vadd.f32 %v1418_v63, %v1417_v62  ;;  %v1420_v3 = vpop.f32.mrb[14].mxu0 }
 0x111   :  { %v452_v4 = vpop.f32.mrb[12].mxu1  ;;  %v1421_v6 = vpop.f32.mrb[15].mxu0 }
 0x112   :  { %v2182_v7 = vadd.f32 %v1419_v1, %v452_v4  ;;  %v1422_v2 = vadd.f32 %v1421_v6, %v1420_v3  ;;  %v454_v5 = vpop.f32.mrb[13].mxu1 }
 0x113   :  { %v455_v9 = vpop.f32.mrb[14].mxu1 }
 0x114   :  { %v2184_v10 = vadd.f32 %v1422_v2, %v455_v9  ;;  %v457_v8 = vpop.f32.mrb[15].mxu1 }
 0x116   :  { %v1439_v11 = vpop.f32.mrb[16].mxu0 }
 0x117   :  { %v1440_v12 = vpop.f32.mrb[17].mxu0 }
 0x118   :  { %v1441_v13 = vadd.f32 %v1440_v12, %v1439_v11  ;;  %v1442_v14 = vpop.f32.mrb[18].mxu0 }
 0x119   :  { %v1443_v15 = vpop.f32.mrb[19].mxu0 }
 0x11a   :  { %v1444_v16 = vadd.f32 %v1443_v15, %v1442_v14 }
 0x11d   :  { %v662_v17 = vpop.f32.mrb[16].mxu1 }
 0x11e   :  { %v2186_v18 = vadd.f32 %v1441_v13, %v662_v17  ;;  %v664_v19 = vpop.f32.mrb[17].mxu1  ;;  %v1445_v0 = vpop.f32.mrb[20].mxu0 }
 0x11f   :  { %v665_v20 = vpop.f32.mrb[18].mxu1  ;;  %v1446_v21 = vpop.f32.mrb[21].mxu0 }
 0x120   :  { %v1161_v22 = vmax.f32 %v2170_v33, %v2186_v18  ;;  %v2190_v23 = vadd.f32 %v1444_v16, %v665_v20  ;;  %v667_v24 = vpop.f32.mrb[19].mxu1  ;;  %v1447_v25 = vadd.f32 %v1446_v21, %v1445_v0  ;;  %v1448_v26 = vpop.f32.mrb[22].mxu0 }
 0x121   :  { %v1449_v27 = vpop.f32.mrb[23].mxu0 }
 0x122   :  { %v1162_v28 = vmax.f32 %v2172_v36, %v2190_v23  ;;  %v1450_v29 = vadd.f32 %v1449_v27, %v1448_v26 }
 0x125   :  { %v670_v30 = vpop.f32.mrb[20].mxu1 }
 0x126   :  { %v2194_v31 = vadd.f32 %v1447_v25, %v670_v30  ;;  %v672_v32 = vpop.f32.mrb[21].mxu1  ;;  %v1451_v34 = vpop.f32.mrb[24].mxu0 }
 0x127   :  { %v673_v35 = vpop.f32.mrb[22].mxu1  ;;  %v1452_v37 = vpop.f32.mrb[25].mxu0 }
 0x128   :  { %v1163_v38 = vmax.f32 %v2174_v44, %v2194_v31  ;;  %v2198_v39 = vadd.f32 %v1450_v29, %v673_v35  ;;  %v675_v40 = vpop.f32.mrb[23].mxu1  ;;  %v1453_v41 = vadd.f32 %v1452_v37, %v1451_v34  ;;  %v1454_v42 = vpop.f32.mrb[26].mxu0 }
 0x129   :  { %v1455_v43 = vpop.f32.mrb[27].mxu0 }
 0x12a   :  { %v1164_v45 = vmax.f32 %v2176_v48, %v2198_v39  ;;  %v1456_v46 = vadd.f32 %v1455_v43, %v1454_v42 }
 0x12d   :  { %v678_v47 = vpop.f32.mrb[24].mxu1 }
 0x12e   :  { %v2202_v49 = vadd.f32 %v1453_v41, %v678_v47  ;;  %v680_v50 = vpop.f32.mrb[25].mxu1  ;;  %v1457_v51 = vpop.f32.mrb[28].mxu0 }
 0x12f   :  { %v681_v52 = vpop.f32.mrb[26].mxu1  ;;  %v1458_v53 = vpop.f32.mrb[29].mxu0 }
 0x130   :  { %v1165_v54 = vmax.f32 %v2178_v56, %v2202_v49  ;;  %v2206_v55 = vadd.f32 %v1456_v46, %v681_v52  ;;  %v683_v57 = vpop.f32.mrb[27].mxu1  ;;  %v1459_v58 = vadd.f32 %v1458_v53, %v1457_v51  ;;  %v1460_v59 = vpop.f32.mrb[30].mxu0 }
 0x131   :  { %v1461_v61 = vpop.f32.mrb[31].mxu0 }
 0x132   :  { %v1166_v62 = vmax.f32 %v2180_v60, %v2206_v55  ;;  %v1462_v63 = vadd.f32 %v1461_v61, %v1460_v59 }
 0x135   :  { %v686_v1 = vpop.f32.mrb[28].mxu1 }
 0x136   :  { %v2210_v3 = vadd.f32 %v1459_v58, %v686_v1  ;;  %v688_v4 = vpop.f32.mrb[29].mxu1 }
 0x137   :  { %v689_v6 = vpop.f32.mrb[30].mxu1  ;;  %v1479_v2 = vpop.f32.mrb[32].mxu0 }
 0x138   :  { %v1167_v5 = vmax.f32 %v2182_v7, %v2210_v3  ;;  %v2214_v9 = vadd.f32 %v1462_v63, %v689_v6  ;;  %v691_v8 = vpop.f32.mrb[31].mxu1  ;;  %v1480_v11 = vpop.f32.mrb[33].mxu0 }
 0x139   :  { %v1481_v12 = vadd.f32 %v1480_v11, %v1479_v2  ;;  %v1482_v13 = vpop.f32.mrb[34].mxu0 }
 0x13a   :  { %v1168_v14 = vmax.f32 %v2184_v10, %v2214_v9  ;;  %v1483_v15 = vpop.f32.mrb[35].mxu0 }
 0x13b   :  { %v1484_v16 = vadd.f32 %v1483_v15, %v1482_v13 }
 0x13f   :  { %v1485_v17 = vpop.f32.mrb[36].mxu0 }
 0x140   :  { %v1486_v19 = vpop.f32.mrb[37].mxu0 }
 0x141   :  { %v896_v0 = vpop.f32.mrb[32].mxu1  ;;  %v1487_v20 = vadd.f32 %v1486_v19, %v1485_v17  ;;  %v1488_v21 = vpop.f32.mrb[38].mxu0 }
 0x142   :  { %v2218_v24 = vadd.f32 %v1481_v12, %v896_v0  ;;  %v898_v25 = vpop.f32.mrb[33].mxu1  ;;  %v1489_v26 = vpop.f32.mrb[39].mxu0 }
 0x143   :  { %v899_v27 = vpop.f32.mrb[34].mxu1  ;;  %v1490_v29 = vadd.f32 %v1489_v26, %v1488_v21 }
 0x144   :  { %v2220_v30 = vadd.f32 %v1484_v16, %v899_v27  ;;  %v901_v32 = vpop.f32.mrb[35].mxu1 }
 0x147   :  { %v1491_v34 = vpop.f32.mrb[40].mxu0 }
 0x148   :  { %v1492_v35 = vpop.f32.mrb[41].mxu0 }
 0x149   :  { %v904_v37 = vpop.f32.mrb[36].mxu1  ;;  %v1493_v40 = vadd.f32 %v1492_v35, %v1491_v34  ;;  %v1494_v41 = vpop.f32.mrb[42].mxu0 }
 0x14a   :  { %v2222_v42 = vadd.f32 %v1487_v20, %v904_v37  ;;  %v906_v43 = vpop.f32.mrb[37].mxu1  ;;  %v1495_v46 = vpop.f32.mrb[43].mxu0 }
 0x14b   :  { %v907_v47 = vpop.f32.mrb[38].mxu1  ;;  %v1496_v50 = vadd.f32 %v1495_v46, %v1494_v41 }
 0x14c   :  { %v2224_v51 = vadd.f32 %v1490_v29, %v907_v47  ;;  %v909_v52 = vpop.f32.mrb[39].mxu1 }
 0x14f   :  { %v1497_v53 = vpop.f32.mrb[44].mxu0 }
 0x150   :  { %v1498_v57 = vpop.f32.mrb[45].mxu0 }
 0x151   :  { %v912_v58 = vpop.f32.mrb[40].mxu1  ;;  %v1499_v59 = vadd.f32 %v1498_v57, %v1497_v53  ;;  %v1500_v61 = vpop.f32.mrb[46].mxu0 }
 0x152   :  { %v2226_v63 = vadd.f32 %v1493_v40, %v912_v58  ;;  %v914_v1 = vpop.f32.mrb[41].mxu1  ;;  %v1501_v4 = vpop.f32.mrb[47].mxu0 }
 0x153   :  { %v915_v6 = vpop.f32.mrb[42].mxu1  ;;  %v1502_v2 = vadd.f32 %v1501_v4, %v1500_v61 }
 0x154   :  { %v2228_v8 = vadd.f32 %v1496_v50, %v915_v6  ;;  %v917_v11 = vpop.f32.mrb[43].mxu1 }
 0x157   :  { %v1519_v12 = vpop.f32.mrb[48].mxu0 }
 0x158   :  { %v1520_v13 = vpop.f32.mrb[49].mxu0 }
 0x159   :  { %v920_v15 = vpop.f32.mrb[44].mxu1  ;;  %v1521_v16 = vadd.f32 %v1520_v13, %v1519_v12  ;;  %v1522_v17 = vpop.f32.mrb[50].mxu0 }
 0x15a   :  { %v2230_v19 = vadd.f32 %v1499_v59, %v920_v15  ;;  %v922_v0 = vpop.f32.mrb[45].mxu1  ;;  %v1523_v20 = vpop.f32.mrb[51].mxu0  ;;  %v2238_v59 = vld [vmem:[%s2316_s5] ss:$0 sm:$0xff] }
 0x15b   :  { %v923_v21 = vpop.f32.mrb[46].mxu1  ;;  %v1524_v25 = vadd.f32 %v1523_v20, %v1522_v17 }
 0x15c   :  { %v2232_v26 = vadd.f32 %v1502_v2, %v923_v21  ;;  %v925_v27 = vpop.f32.mrb[47].mxu1 }
 0x15f   :  { %v1525_v29 = vpop.f32.mrb[52].mxu0 }
 0x160   :  { %v1526_v32 = vpop.f32.mrb[53].mxu0 }
 0x161   :  { %v1527_v34 = vadd.f32 %v1526_v32, %v1525_v29  ;;  %v1528_v35 = vpop.f32.mrb[54].mxu0 }
 0x162   :  { %v1529_v37 = vpop.f32.mrb[55].mxu0 }
 0x163   :  { %v1530_v40 = vadd.f32 %v1529_v37, %v1528_v35 }
 0x165   :  { %v1130_v41 = vpop.f32.mrb[48].mxu1 }
 0x166   :  { %v1131_v43 = vadd.f32 %v1521_v16, %v1130_v41  ;;  %v1132_v46 = vpop.f32.mrb[49].mxu1 }
 0x167   :  { %v1133_v47 = vpop.f32.mrb[50].mxu1  ;;  %v1531_v50 = vpop.f32.mrb[56].mxu0 }
 0x168   :  { %v1169_v52 = vmax.f32 %v2218_v24, %v1131_v43  ;;  %v1134_v53 = vadd.f32 %v1524_v25, %v1133_v47  ;;  %v1135_v57 = vpop.f32.mrb[51].mxu1  ;;  %v1532_v58 = vpop.f32.mrb[57].mxu0 }
 0x169   :  { %v1533_v61 = vadd.f32 %v1532_v58, %v1531_v50  ;;  %v1534_v1 = vpop.f32.mrb[58].mxu0 }
 0x16a   :  { %v1177_v4 = vmax.f32 %v1161_v22, %v1169_v52  ;;  %v1170_v6 = vmax.f32 %v2220_v30, %v1134_v53  ;;  %v1535_v2 = vpop.f32.mrb[59].mxu0 }
 0x16b   :  { %v1536_v11 = vadd.f32 %v1535_v2, %v1534_v1 }
 0x16c   :  { %v1192_v24 = vadd.f32 %v2238_v59, %v1177_v4  ;;  %v1178_v12 = vmax.f32 %v1162_v28, %v1170_v6 }
 0x16d   :  { %v1138_v13 = vpop.f32.mrb[52].mxu1 }
 0x16e   :  { %v1200_v15 = vmul.f32 0.01, %v1192_v24  ;;  %v1193_v16 = vadd.f32 %v2238_v59, %v1178_v12  ;;  %v1139_v17 = vadd.f32 %v1527_v34, %v1138_v13  ;;  %v1140_v0 = vpop.f32.mrb[53].mxu1 }
 0x16f   :  { %v1141_v20 = vpop.f32.mrb[54].mxu1  ;;  %v1537_v21 = vpop.f32.mrb[60].mxu0 }
 0x170   :  { %v1208_v33 = vmax.f32 %v1192_v24, %v1200_v15  ;;  %v1201_v18 = vmul.f32 0.01, %v1193_v16  ;;  %v1171_v22 = vmax.f32 %v2222_v42, %v1139_v17  ;;  %v1142_v30 = vadd.f32 %v1530_v40, %v1141_v20  ;;  %v1143_v25 = vpop.f32.mrb[55].mxu1  ;;  %v1538_v27 = vpop.f32.mrb[61].mxu0 }
 0x171   :  { %v1539_v29 = vadd.f32 %v1538_v27, %v1537_v21  ;;  %v1540_v32 = vpop.f32.mrb[62].mxu0 }
 0x172   :  { %v1375_v36 = vpack.c.bf16 %v1208_v33, %v1208_v33  ;;  %v1209_v23 = vmax.f32 %v1193_v16, %v1201_v18  ;;  %v1179_v28 = vmax.f32 %v1163_v38, %v1171_v22  ;;  %v1172_v34 = vmax.f32 %v2224_v51, %v1142_v30  ;;  %v1541_v35 = vpop.f32.mrb[63].mxu0 }
 0x173   :  { %v1542_v37 = vadd.f32 %v1541_v35, %v1540_v32 }
 0x174   :  { %1249 = vst.msk [vmem:[%s2317_s6] sm:$0xf] %vm1248_vm1, %v1375_v36  ;;  %v1376_v42 = vpack.c.bf16 %v1209_v23, %v1209_v23  ;;  %v1194_v40 = vadd.f32 %v2238_v59, %v1179_v28  ;;  %v1180_v41 = vmax.f32 %v1164_v45, %v1172_v34 }
 0x175   :  { %v1146_v43 = vpop.f32.mrb[56].mxu1 }
 0x176   :  { %1250 = vst.msk [vmem:[%s2317_s6 + $0x4] sm:$0xf] %vm1248_vm1, %v1376_v42  ;;  %v1202_v44 = vmul.f32 0.01, %v1194_v40  ;;  %v1195_v31 = vadd.f32 %v2238_v59, %v1180_v41  ;;  %v1147_v38 = vadd.f32 %v1533_v61, %v1146_v43  ;;  %v1148_v51 = vpop.f32.mrb[57].mxu1 }
 0x177   :  { %v1149_v46 = vpop.f32.mrb[58].mxu1 }
 0x178   :  { %v1210_v47 = vmax.f32 %v1194_v40, %v1202_v44  ;;  %v1203_v50 = vmul.f32 0.01, %v1195_v31  ;;  %v1173_v52 = vmax.f32 %v2226_v63, %v1147_v38  ;;  %v1150_v53 = vadd.f32 %v1536_v11, %v1149_v46  ;;  %v1151_v57 = vpop.f32.mrb[59].mxu1 }
 0x17a   :  { %v1377_v48 = vpack.c.bf16 %v1210_v47, %v1210_v47  ;;  %v1211_v39 = vmax.f32 %v1195_v31, %v1203_v50  ;;  %v1181_v45 = vmax.f32 %v1165_v54, %v1173_v52  ;;  %v1174_v58 = vmax.f32 %v2228_v8, %v1150_v53 }
 0x17c   :  { %1251 = vst.msk [vmem:[%s2317_s6 + $0x8] sm:$0xf] %vm1248_vm1, %v1377_v48  ;;  %v1378_v61 = vpack.c.bf16 %v1211_v39, %v1211_v39  ;;  %v1196_v1 = vadd.f32 %v2238_v59, %v1181_v45  ;;  %v1182_v63 = vmax.f32 %v1166_v62, %v1174_v58 }
 0x17d   :  { %v1154_v4 = vpop.f32.mrb[60].mxu1 }
 0x17e   :  { %1252 = vst.msk [vmem:[%s2317_s6 + $0xc] sm:$0xf] %vm1248_vm1, %v1378_v61  ;;  %v1204_v56 = vmul.f32 0.01, %v1196_v1  ;;  %v1197_v49 = vadd.f32 %v2238_v59, %v1182_v63  ;;  %v1155_v54 = vadd.f32 %v1539_v29, %v1154_v4  ;;  %v1156_v8 = vpop.f32.mrb[61].mxu1 }
 0x17f   :  { %v1157_v6 = vpop.f32.mrb[62].mxu1 }
 0x180   :  { %v1212_v2 = vmax.f32 %v1196_v1, %v1204_v56  ;;  %v1205_v11 = vmul.f32 0.01, %v1197_v49  ;;  %v1175_v24 = vmax.f32 %v2230_v19, %v1155_v54  ;;  %v1158_v12 = vadd.f32 %v1542_v37, %v1157_v6  ;;  %v1159_v13 = vpop.f32.mrb[63].mxu1 }
 0x182   :  { %v1379_v60 = vpack.c.bf16 %v1212_v2, %v1212_v2  ;;  %v1213_v55 = vmax.f32 %v1197_v49, %v1205_v11  ;;  %v1183_v62 = vmax.f32 %v1167_v5, %v1175_v24  ;;  %v1176_v15 = vmax.f32 %v2232_v26, %v1158_v12 }
 0x184   :  { %1253 = vst.msk [vmem:[%s2317_s6 + $0x10] sm:$0xf] %vm1248_vm1, %v1379_v60  ;;  %v1380_v16 = vpack.c.bf16 %v1213_v55, %v1213_v55  ;;  %v1198_v17 = vadd.f32 %v2238_v59, %v1183_v62  ;;  %v1184_v19 = vmax.f32 %v1168_v14, %v1176_v15 }
 0x186   :  { %1254 = vst.msk [vmem:[%s2317_s6 + $0x14] sm:$0xf] %vm1248_vm1, %v1380_v16  ;;  %v1206_v7 = vmul.f32 0.01, %v1198_v17  ;;  %v1199_v3 = vadd.f32 %v2238_v59, %v1184_v19 }
 0x188   :  { %v1214_v5 = vmax.f32 %v1198_v17, %v1206_v7  ;;  %v1207_v26 = vmul.f32 0.01, %v1199_v3 }
 0x18a   :  { %v1381_v0 = vpack.c.bf16 %v1214_v5, %v1214_v5  ;;  %v1215_v20 = vmax.f32 %v1199_v3, %v1207_v26 }
 0x18c   :  { %1255 = vst.msk [vmem:[%s2317_s6 + $0x18] sm:$0xf] %vm1248_vm1, %v1381_v0  ;;  %v1382_v21 = vpack.c.bf16 %v1215_v20, %v1215_v20 }
 0x18e   :  { %1256 = vst.msk [vmem:[%s2317_s6 + $0x1c] sm:$0xf] %vm1248_vm1, %v1382_v21 }

// kernel: cnn_fmnist_forward.5
= control target key start
LH: loop header
LB: loop body
LE: loop exit
PB: predicated region body
PF: predicated region fallthrough
CT: control target
= control target key end

     0   :  { %v1194_v38 = vmov 0.0   ;;  %vm1195_vm0 = vmmov 0   ;;  %vm479_vm1 = vcmask 261120   ;;  %s1505_s1 = inlined_call_operand.vmem [shape: bf16[800,128], index: 1, kind: input, shape index: {}]   ;;  %s1506_s0 = inlined_call_operand.vmem [shape: bf16[16,800], index: 0, kind: input, shape index: {}]   ;;  %s1507_s3 = inlined_call_operand.vmem [shape: bf16[128,128], index: 3, kind: input, shape index: {}]   ;;  %s1508_s5 = inlined_call_operand.vmem [shape: bf16[128,128], index: 5, kind: input, shape index: {}]   ;;  %s1509_s2 = inlined_call_operand.vmem [shape: f32[1,128], index: 2, kind: input, shape index: {}]   ;;  %s1510_s4 = inlined_call_operand.vmem [shape: f32[1,128], index: 4, kind: input, shape index: {}]   ;;  %s1511_s6 = inlined_call_operand.vmem [shape: f32[1,128], index: 6, kind: input, shape index: {}]   ;;  %s1512_s7 = inlined_call_operand.vmem [shape: f32[16,128], index: 7, kind: output, shape index: {0}]   ;;  %s1513_s8 = inlined_call_operand.vmem [shape: f32[16,128], index: 8, kind: output, shape index: {1}]  }
   0x1   :  { %v1114_v0 = vld [vmem:[%s1505_s1 + $0x40] sm:$0xff]   ;;  %v1118_v4 = vld [vmem:[%s1505_s1 + $0x48] sm:$0xff]   ;;  %v1122_v8 = vld [vmem:[%s1505_s1 + $0x50] sm:$0xff]  }
   0x2   :  { %v1115_v1 = vld [vmem:[%s1505_s1] sm:$0xff]   ;;  %977 = vmatprep.subr.bf16.mxu0 %v1114_v0  ;;  %v1119_v5 = vld [vmem:[%s1505_s1 + $0x8] sm:$0xff]   ;;  %v1123_v9 = vld [vmem:[%s1505_s1 + $0x10] sm:$0xff]  }
   0x3   :  { %v1116_v2 = vld [vmem:[%s1505_s1 + $0xc0] sm:$0xff]   ;;  %978 = vmatpush3.bf16.msra.mxu0 %v1115_v1  ;;  %v1120_v6 = vld [vmem:[%s1505_s1 + $0xc8] sm:$0xff]   ;;  %v1124_v10 = vld [vmem:[%s1505_s1 + $0xd0] sm:$0xff]  }
   0x4   :  { %v1117_v3 = vld [vmem:[%s1505_s1 + $0x80] sm:$0xff]   ;;  %999 = vmatprep.subr.bf16.mxu1 %v1116_v2  ;;  %979 = vmatprep.subr.bf16.mxu0 %v1118_v4  ;;  %v1121_v7 = vld [vmem:[%s1505_s1 + $0x88] sm:$0xff]   ;;  %v1125_v11 = vld [vmem:[%s1505_s1 + $0x90] sm:$0xff]  }
   0x5   :  { %1000 = vmatpush3.bf16.msra.mxu1 %v1117_v3  ;;  %v1126_v12 = vld [vmem:[%s1505_s1 + $0x58] sm:$0xff]   ;;  %v1130_v16 = vld [vmem:[%s1505_s1 + $0x60] sm:$0xff]   ;;  %v1134_v20 = vld [vmem:[%s1505_s1 + $0x68] sm:$0xff]  }
   0x6   :  { %1001 = vmatprep.subr.bf16.mxu1 %v1120_v6  ;;  %v1127_v13 = vld [vmem:[%s1505_s1 + $0x18] sm:$0xff]   ;;  %v1131_v17 = vld [vmem:[%s1505_s1 + $0x20] sm:$0xff]   ;;  %v1135_v21 = vld [vmem:[%s1505_s1 + $0x28] sm:$0xff]  }
   0x7   :  { %980 = vmatpush3.bf16.msra.mxu0 %v1119_v5  ;;  %v1128_v14 = vld [vmem:[%s1505_s1 + $0xd8] sm:$0xff]   ;;  %v1132_v18 = vld [vmem:[%s1505_s1 + $0xe0] sm:$0xff]   ;;  %v1136_v22 = vld [vmem:[%s1505_s1 + $0xe8] sm:$0xff]  }
   0x8   :  { %981 = vmatprep.subr.bf16.mxu0 %v1122_v8  ;;  %v1129_v15 = vld [vmem:[%s1505_s1 + $0x98] sm:$0xff]   ;;  %v1133_v19 = vld [vmem:[%s1505_s1 + $0xa0] sm:$0xff]   ;;  %v1137_v23 = vld [vmem:[%s1505_s1 + $0xa8] sm:$0xff]  }
   0x9   :  { %1002 = vmatpush3.bf16.msra.mxu1 %v1121_v7  ;;  %v1138_v24 = vld [vmem:[%s1505_s1 + $0x70] sm:$0xff]   ;;  %v1142_v28 = vld [vmem:[%s1505_s1 + $0x78] sm:$0xff]   ;;  %v1147_v32 = vld [vmem:[%s1506_s0 + $0x4] ss:$28 sps:$4 sm:$0xff]  }
   0xa   :  { %1003 = vmatprep.subr.bf16.mxu1 %v1124_v10  ;;  %v1139_v25 = vld [vmem:[%s1505_s1 + $0x30] sm:$0xff]   ;;  %v1143_v29 = vld [vmem:[%s1505_s1 + $0x38] sm:$0xff]   ;;  %515 = vmatprep.mubr.bf16.mxu0 %v1147_v32  ;;  %v1149_v34 = vld [vmem:[%s1505_s1 + $0x140] sm:$0xff]  }
   0xb   :  { %982 = vmatpush3.bf16.msra.mxu0 %v1123_v9  ;;  %v1140_v26 = vld [vmem:[%s1505_s1 + $0xf0] sm:$0xff]   ;;  %v1144_v30 = vld [vmem:[%s1505_s1 + $0xf8] sm:$0xff]   ;;  %v1150_v35 = vld [vmem:[%s1506_s0 + $0x8] ss:$28 sps:$4 sm:$0xff]  }
   0xc   :  { %983 = vmatprep.subr.bf16.mxu0 %v1126_v12  ;;  %v1141_v27 = vld [vmem:[%s1505_s1 + $0xb0] sm:$0xff]   ;;  %v1145_v31 = vld [vmem:[%s1506_s0] ss:$28 sps:$4 sm:$0xff]   ;;  %v1152_v36 = vld [vmem:[%s1506_s0 + $0xc] ss:$28 sps:$4 sm:$0xff]  }
   0xd   :  { %1004 = vmatpush3.bf16.msra.mxu1 %v1125_v11  ;;  %v1148_v33 = vld [vmem:[%s1505_s1 + $0xb8] sm:$0xff]   ;;  %v1153_v37 = vld [vmem:[%s1505_s1 + $0x100] sm:$0xff]   ;;  %556 = vmatprep.mubr.bf16.mxu1 %v1152_v36  ;;  %v1154_v39 = vld [vmem:[%s1505_s1 + $0x148] sm:$0xff]  }
   0xe   :  { %1005 = vmatprep.subr.bf16.mxu1 %v1128_v14  ;;  %v1155_v40 = vld [vmem:[%s1505_s1 + $0x108] sm:$0xff]   ;;  %v1156_v41 = vld [vmem:[%s1505_s1 + $0x150] sm:$0xff]   ;;  %v1158_v43 = vld [vmem:[%s1505_s1 + $0x158] sm:$0xff]  }
   0xf   :  { %984 = vmatpush3.bf16.msra.mxu0 %v1127_v13  ;;  %v1157_v42 = vld [vmem:[%s1505_s1 + $0x110] sm:$0xff]   ;;  %v1159_v44 = vld [vmem:[%s1505_s1 + $0x118] sm:$0xff]   ;;  %v1160_v45 = vld [vmem:[%s1505_s1 + $0x160] sm:$0xff]  }
  0x10   :  { %985 = vmatprep.subr.bf16.mxu0 %v1130_v16  ;;  %v1166_v46 = vld [vmem:[%s1505_s1 + $0x180] sm:$0xff]   ;;  %v1162_v48 = vld [vmem:[%s1505_s1 + $0x168] sm:$0xff]   ;;  %v1171_v50 = vld [vmem:[%s1506_s0 + $0x14] ss:$28 sps:$4 sm:$0xff]  }
  0x11   :  { %1006 = vmatpush3.bf16.msra.mxu1 %v1129_v15  ;;  %v1161_v47 = vld [vmem:[%s1505_s1 + $0x120] sm:$0xff]   ;;  %v1163_v49 = vld [vmem:[%s1505_s1 + $0x128] sm:$0xff]   ;;  %v1173_v52 = vld [vmem:[%s1506_s0 + $0x18] ss:$28 sps:$4 sm:$0xff]  }
  0x12   :  { %1007 = vmatprep.subr.bf16.mxu1 %v1132_v18  ;;  %v1172_v51 = vld [vmem:[%s1505_s1 + $0x188] sm:$0xff]   ;;  %v1164_v53 = vld [vmem:[%s1505_s1 + $0x170] sm:$0xff]   ;;  %v1167_v55 = vld [vmem:[%s1505_s1 + $0x178] sm:$0xff]  }
  0x13   :  { %986 = vmatpush3.bf16.msra.mxu0 %v1131_v17  ;;  %v1165_v54 = vld [vmem:[%s1505_s1 + $0x130] sm:$0xff]   ;;  %v1168_v56 = vld [vmem:[%s1505_s1 + $0x138] sm:$0xff]   ;;  %v1174_v58 = vld [vmem:[%s1507_s3] sm:$0xff]  }
  0x14   :  { %987 = vmatprep.subr.bf16.mxu0 %v1134_v20  ;;  %v1169_v57 = vld [vmem:[%s1506_s0 + $0x10] ss:$28 sps:$4 sm:$0xff]   ;;  %v1175_v59 = vld [vmem:[%s1508_s5] sm:$0xff]   ;;  %v1180_v0 = vld [vmem:[%s1507_s3 + $0x18] sm:$0xff]  }
  0x15   :  { %1008 = vmatpush3.bf16.msra.mxu1 %v1133_v19  ;;  %v1176_v60 = vld [vmem:[%s1507_s3 + $0x8] sm:$0xff]   ;;  %v1178_v62 = vld [vmem:[%s1507_s3 + $0x10] sm:$0xff]   ;;  %v1181_v1 = vld [vmem:[%s1508_s5 + $0x18] sm:$0xff]  }
  0x16   :  { %1009 = vmatprep.subr.bf16.mxu1 %v1136_v22  ;;  %v1177_v61 = vld [vmem:[%s1508_s5 + $0x8] sm:$0xff]   ;;  %v1179_v63 = vld [vmem:[%s1508_s5 + $0x10] sm:$0xff]   ;;  %v1182_v2 = vld [vmem:[%s1507_s3 + $0x20] sm:$0xff]  }
  0x17   :  { %988 = vmatpush3.bf16.msra.mxu0 %v1135_v21  ;;  %v1183_v3 = vld [vmem:[%s1508_s5 + $0x20] sm:$0xff]   ;;  %v1184_v4 = vld [vmem:[%s1507_s3 + $0x28] sm:$0xff]   ;;  %v1186_v6 = vld [vmem:[%s1507_s3 + $0x30] sm:$0xff]  }
  0x18   :  { %989 = vmatprep.subr.bf16.mxu0 %v1138_v24  ;;  %v1185_v5 = vld [vmem:[%s1508_s5 + $0x28] sm:$0xff]   ;;  %v1187_v7 = vld [vmem:[%s1508_s5 + $0x30] sm:$0xff]   ;;  %v1188_v8 = vld [vmem:[%s1507_s3 + $0x38] sm:$0xff]  }
  0x19   :  { %1010 = vmatpush3.bf16.msra.mxu1 %v1137_v23  ;;  %v1189_v9 = vld [vmem:[%s1508_s5 + $0x38] sm:$0xff]   ;;  %v900_v11 = vld [vmem:[%s1509_s2] ss:$0 sm:$0xff] }
  0x1a   :  { %1011 = vmatprep.subr.bf16.mxu1 %v1140_v26 }
  0x1b   :  { %990 = vmatpush3.bf16.msra.mxu0 %v1139_v25 }
  0x1c   :  { %991 = vmatprep.subr.bf16.mxu0 %v1142_v28 }
  0x1d   :  { %1012 = vmatpush3.bf16.msra.mxu1 %v1141_v27 }
  0x1e   :  { %1013 = vmatprep.subr.bf16.mxu1 %v1144_v30 }
  0x1f   :  { %992 = vmatpush3.bf16.msra.mxu0 %v1143_v29 }
  0x20   :  { %1021 = vmatprep.subr.bf16.mxu0 %v1149_v34 }
  0x21   :  { %1014 = vmatpush3.bf16.msra.mxu1 %v1148_v33 }
  0x22   :  { %516 = vmatmul.mubr.bf16.vlgmr.msra.gmra.mrb[0].mxu0 %v1145_v31  ;;  %1064 = vmatprep.subr.bf16.mxu1 %v1194_v38 }
  0x23   :  { %1022 = vmatpush3.bf16.msra.mxu0 %v1153_v37  ;;  %597 = vmatprep.mubr.bf16.mxu0 %v1171_v50 }
  0x24   :  { %557 = vmatmul.mubr.bf16.vlgmr.msra.gmra.mrb[0].mxu1 %v1150_v35  ;;  %1023 = vmatprep.subr.bf16.mxu0 %v1154_v39 }
  0x25   :  { %1068 = vmatprep.mubr.msk.bf16.mxu1 %vm1195_vm0, %v1194_v38  ;;  %1065 = vmatpush3.bf16.msra.mxu1 %v1166_v46  ;;  %v959_v46 = vld [vmem:[%s1510_s4] ss:$0 sm:$0xff] }
  0x26   :  { %1066 = vmatprep.subr.bf16.mxu1 %v1194_v38 }
  0x27   :  { %1024 = vmatpush3.bf16.msra.mxu0 %v1155_v40 }
  0x28   :  { %1025 = vmatprep.subr.bf16.mxu0 %v1156_v41 }
  0x29   :  { %1067 = vmatpush3.bf16.msra.mxu1 %v1172_v51 }
  0x2a   :  { %1072 = vmatprep.subr.bf16.mxu1 %v1194_v38 }
  0x2b   :  { %1026 = vmatpush3.bf16.msra.mxu0 %v1157_v42 }
  0x2c   :  { %1027 = vmatprep.subr.bf16.mxu0 %v1158_v43  ;;  %1069 = vmatmul.mubr.msk.bf16.vlgmr.msra.gmra.mrb[4].mxu1 %vm479_vm1, %v1173_v52 }
  0x2d   :  { %1088 = vmatprep.mubr.msk.bf16.mxu1 %vm1195_vm0, %v1194_v38  ;;  %1073 = vmatpush3.bf16.msra.mxu1 %v1174_v58 }
  0x2e   :  { %1074 = vmatprep.subr.bf16.mxu1 %v1194_v38 }
  0x2f   :  { %1028 = vmatpush3.bf16.msra.mxu0 %v1159_v44 }
  0x30   :  { %1029 = vmatprep.subr.bf16.mxu0 %v1160_v45 }
  0x31   :  { %1075 = vmatpush3.bf16.msra.mxu1 %v1176_v60 }
  0x32   :  { %1076 = vmatprep.subr.bf16.mxu1 %v1194_v38 }
  0x33   :  { %1030 = vmatpush3.bf16.msra.mxu0 %v1161_v47  ;;  %v968_v47 = vld [vmem:[%s1511_s6] ss:$0 sm:$0xff] }
  0x34   :  { %1031 = vmatprep.subr.bf16.mxu0 %v1162_v48 }
  0x35   :  { %1077 = vmatpush3.bf16.msra.mxu1 %v1178_v62 }
  0x36   :  { %1078 = vmatprep.subr.bf16.mxu1 %v1194_v38 }
  0x37   :  { %1032 = vmatpush3.bf16.msra.mxu0 %v1163_v49 }
  0x38   :  { %1033 = vmatprep.subr.bf16.mxu0 %v1164_v53 }
  0x39   :  { %1079 = vmatpush3.bf16.msra.mxu1 %v1180_v0 }
  0x3a   :  { %1080 = vmatprep.subr.bf16.mxu1 %v1194_v38 }
  0x3b   :  { %1034 = vmatpush3.bf16.msra.mxu0 %v1165_v54 }
  0x3c   :  { %1035 = vmatprep.subr.bf16.mxu0 %v1167_v55 }
  0x3d   :  { %1081 = vmatpush3.bf16.msra.mxu1 %v1182_v2 }
  0x3e   :  { %1082 = vmatprep.subr.bf16.mxu1 %v1194_v38 }
  0x3f   :  { %1036 = vmatpush3.bf16.msra.mxu0 %v1168_v56 }
  0x40   :  { %1092 = vmatprep.subr.bf16.mxu0 %v1194_v38 }
  0x41   :  { %1083 = vmatpush3.bf16.msra.mxu1 %v1184_v4 }
  0x42   :  { %598 = vmatmul.mubr.bf16.vlgmr.msra.gmra.mrb[4].mxu0 %v1169_v57  ;;  %1084 = vmatprep.subr.bf16.mxu1 %v1194_v38 }
  0x43   :  { %1108 = vmatprep.mubr.msk.bf16.mxu0 %vm1195_vm0, %v1194_v38  ;;  %1093 = vmatpush3.bf16.msra.mxu0 %v1175_v59 }
  0x44   :  { %1094 = vmatprep.subr.bf16.mxu0 %v1194_v38 }
  0x45   :  { %1085 = vmatpush3.bf16.msra.mxu1 %v1186_v6 }
  0x46   :  { %1086 = vmatprep.subr.bf16.mxu1 %v1194_v38 }
  0x47   :  { %1095 = vmatpush3.bf16.msra.mxu0 %v1177_v61 }
  0x48   :  { %1096 = vmatprep.subr.bf16.mxu0 %v1194_v38 }
  0x49   :  { %1087 = vmatpush3.bf16.msra.mxu1 %v1188_v8 }
  0x4b   :  { %1097 = vmatpush3.bf16.msra.mxu0 %v1179_v63 }
  0x4c   :  { %1098 = vmatprep.subr.bf16.mxu0 %v1194_v38 }
  0x4f   :  { %1099 = vmatpush3.bf16.msra.mxu0 %v1181_v1 }
  0x50   :  { %1100 = vmatprep.subr.bf16.mxu0 %v1194_v38 }
  0x53   :  { %1101 = vmatpush3.bf16.msra.mxu0 %v1183_v3 }
  0x54   :  { %1102 = vmatprep.subr.bf16.mxu0 %v1194_v38 }
  0x57   :  { %1103 = vmatpush3.bf16.msra.mxu0 %v1185_v5 }
  0x58   :  { %1104 = vmatprep.subr.bf16.mxu0 %v1194_v38 }
  0x5b   :  { %1105 = vmatpush3.bf16.msra.mxu0 %v1187_v7 }
  0x5c   :  { %1106 = vmatprep.subr.bf16.mxu0 %v1194_v38 }
  0x5f   :  { %1107 = vmatpush3.bf16.msra.mxu0 %v1189_v9 }
  0xf5   :  { %v993_v10 = vpop.f32.mrb[0].mxu0 }
  0xf6   :  { %v994_v12 = vpop.f32.mrb[1].mxu0 }
  0xf7   :  { %v995_v13 = vadd.f32 %v994_v12, %v993_v10  ;;  %v996_v14 = vpop.f32.mrb[2].mxu0  ;;  %v1015_v15 = vpop.f32.mrb[0].mxu1 }
  0xf8   :  { %v997_v16 = vpop.f32.mrb[3].mxu0  ;;  %v1016_v19 = vpop.f32.mrb[1].mxu1 }
  0xf9   :  { %v518_v17 = vadd.f32 %v995_v13, %v900_v11  ;;  %v998_v18 = vadd.f32 %v997_v16, %v996_v14  ;;  %v1017_v20 = vadd.f32 %v1016_v19, %v1015_v15  ;;  %v1018_v21 = vpop.f32.mrb[2].mxu1 }
  0xfa   :  { %v1019_v23 = vpop.f32.mrb[3].mxu1 }
  0xfb   :  { %v521_v22 = vadd.f32 %v998_v18, %v900_v11  ;;  %v559_v24 = vadd.f32 %v1017_v20, %v518_v17  ;;  %v1020_v25 = vadd.f32 %v1019_v23, %v1018_v21 }
  0xfd   :  { %v562_v26 = vadd.f32 %v1020_v25, %v521_v22 }
  0xff   :  { %v640_v27 = vpop.f32.mrb[4].mxu1 }
 0x100   :  { %v1070_v28 = vpop.f32.mrb[5].mxu1 }
 0x101   :  { %v643_v29 = vpop.f32.mrb[6].mxu1 }
 0x102   :  { %v1071_v30 = vpop.f32.mrb[7].mxu1 }
 0x115   :  { %v1037_v31 = vpop.f32.mrb[4].mxu0 }
 0x116   :  { %v1038_v32 = vpop.f32.mrb[5].mxu0 }
 0x117   :  { %v1039_v33 = vadd.f32 %v1038_v32, %v1037_v31  ;;  %v1040_v34 = vpop.f32.mrb[6].mxu0 }
 0x118   :  { %v1041_v35 = vpop.f32.mrb[7].mxu0 }
 0x119   :  { %v600_v36 = vadd.f32 %v1039_v33, %v559_v24  ;;  %v1042_v37 = vadd.f32 %v1041_v35, %v1040_v34 }
 0x11b   :  { %v641_v38 = vadd.f32 %v640_v27, %v600_v36  ;;  %v603_v39 = vadd.f32 %v1042_v37, %v562_v26 }
 0x11d   :  { %v647_v40 = vmul.f32 0.01, %v641_v38  ;;  %v644_v41 = vadd.f32 %v643_v29, %v603_v39 }
 0x11f   :  { %v648_v42 = vmul.f32 0.01, %v644_v41  ;;  %v649_v43 = vmax.f32 %v641_v38, %v647_v40 }
 0x121   :  { %v650_v44 = vmax.f32 %v644_v41, %v648_v42 }
 0x123   :  { %v651_v45 = vpack.c.bf16 %v650_v44, %v649_v43 }
 0x125   :  { %1089 = vmatmul.mubr.bf16.vlgmr.msra.gmra.mrb[8].mxu1 %v651_v45  ;;  %1109 = vmatmul.mubr.bf16.vlgmr.msra.gmra.mrb[8].mxu0 %v651_v45 }
 0x1f8   :  { %v757_v48 = vpop.f32.mrb[8].mxu1  ;;  %v871_v49 = vpop.f32.mrb[8].mxu0 }
 0x1f9   :  { %v758_v50 = vadd.f32 %v959_v46, %v757_v48  ;;  %v872_v51 = vadd.f32 %v968_v47, %v871_v49  ;;  %v1090_v52 = vpop.f32.mrb[9].mxu1  ;;  %v1110_v53 = vpop.f32.mrb[9].mxu0 }
 0x1fa   :  { %v760_v54 = vpop.f32.mrb[10].mxu1  ;;  %v874_v55 = vpop.f32.mrb[10].mxu0 }
 0x1fb   :  { %764 = vst [vmem:[%s1512_s7] sm:$0xff] %v758_v50  ;;  %v761_v56 = vadd.f32 %v959_v46, %v760_v54  ;;  %v875_v57 = vadd.f32 %v968_v47, %v874_v55  ;;  %v1091_v58 = vpop.f32.mrb[11].mxu1  ;;  %v1111_v59 = vpop.f32.mrb[11].mxu0  ;;  %v878_v60 = vmul.f32 %v872_v51, %v872_v51 }
 0x1fd   :  { %765 = vst [vmem:[%s1512_s7 + $0x8] sm:$0xff] %v761_v56  ;;  %880 = vadd.xlane.f32.xlu0 %v878_v60  ;;  %v879_v61 = vmul.f32 %v875_v57, %v875_v57 }
 0x201   :  { %882 = vadd.xlane.f32.xlu0 %v879_v61 }
 0x28a   :  { %v881_v62 = vpop.xlane.xlu0 %880 }
 0x28b   :  { %v884_v63 = vmax.f32 %v881_v62, 1e-24 }
 0x28d   :  { %1190 = vrsqrt.f32 %v884_v63 }
 0x28e   :  { %v883_v0 = vpop.xlane.xlu0 %882 }
 0x28f   :  { %v885_v1 = vmax.f32 %v883_v0, 1e-24 }
 0x291   :  { %1192 = vrsqrt.f32 %v885_v1 }
 0x297   :  { %v1191_v2 = vpop.eup %1190 }
 0x298   :  { %v888_v3 = vmul.f32 %v1191_v2, %v872_v51 }
 0x29a   :  { %890 = vst [vmem:[%s1513_s8] sm:$0xff] %v888_v3 }
 0x29b   :  { %v1193_v4 = vpop.eup %1192 }
 0x29c   :  { %v889_v5 = vmul.f32 %v1193_v4, %v875_v57 }
 0x29e   :  { %891 = vst [vmem:[%s1513_s8 + $0x8] sm:$0xff] %v889_v5 }

</bundles_post_ra>
